<compile_context>
chip_gen: v7x
topology: tpu7x:2x2x1
jax: 0.10.0
libtpu: 0.0.40
codegen_flags: <defaults>
</compile_context>

<pallas_src>
import jax
import jax.numpy as jnp
from jax import lax
from jax.experimental import pallas as pl
from jax.experimental.pallas import tpu as pltpu


def bilstm_max_kernel(xf_ref, xb_ref, wihf_ref, wihb_ref, whhf_ref, whhb_ref,
                      bf_ref, bb_ref, out_ref, h_ref, c_ref, m_ref,
                      gxf_ref, gxb_ref):
    """One T-chunk of a fused bidirectional LSTM + running elementwise max over time.

    Grid axis 0 walks T-chunks sequentially ("arbitrary"); the recurrent state
    (h, c, running max) persists in VMEM scratch across grid steps.

    xf_ref   : (CH, D)  bf16  forward-time chunk i   (rows = batch@t0 | batch@t0+1 | ...)
    xb_ref   : (CH, D)  bf16  chunk n_chunks-1-i     (data the backward pass needs now)
    wih*_ref : (D, 4H)  bf16  per-direction input weights  (gate order i,f,g,o)
    whh*_ref : (H, 4H)  bf16  per-direction hidden weights
    b*_ref   : (1, 4H)  f32   per-direction combined bias (b_ih + b_hh)
    out_ref  : (B, 2H)  f32   [max_t h_fwd | max_t h_bwd], written on the last chunk
    h/c/m    : (2B, H)  f32   persistent carries, rows 0:B forward, B:2B backward
    gx*_ref  : (CH, 4H) f32   per-chunk precomputed input-projection gates
    """
    chunk = pl.program_id(0)
    n_chunks = pl.num_programs(0)

    B2, H = h_ref.shape
    B = B2 // 2
    fourH = 4 * H
    CH = xf_ref.shape[0]
    t_chunk = CH // B

    @pl.when(chunk == 0)
    def _():
        h_ref[...] = jnp.zeros((B2, H), jnp.float32)
        c_ref[...] = jnp.zeros((B2, H), jnp.float32)
        m_ref[...] = jnp.full((B2, H), -jnp.inf, jnp.float32)

    # Per-chunk input projection: both outputs fully used, f32 temporary only chunk-sized.
    gxf_ref[...] = (jnp.dot(xf_ref[...], wihf_ref[...],
                            preferred_element_type=jnp.float32) + bf_ref[...])
    gxb_ref[...] = (jnp.dot(xb_ref[...], wihb_ref[...],
                            preferred_element_type=jnp.float32) + bb_ref[...])

    whh_f = whhf_ref[...]
    whh_b = whhb_ref[...]

    gates_aligned = (H % 128 == 0)                       # static decision
    if not gates_aligned:
        lane4 = lax.broadcasted_iota(jnp.int32, (B2, fourH), 1)
        g_slot = (lane4 >= 2 * H) & (lane4 < 3 * H)      # tanh slot (i,f,g,o order)

    def step(s, carry):
        h, c, m = carry
        fwd_base = pl.multiple_of(s * B, B)
        bwd_base = pl.multiple_of((t_chunk - 1 - s) * B, B)
        gx_f = gxf_ref[pl.ds(fwd_base, B), :]            # (B, 4H) aligned loads
        gx_b = gxb_ref[pl.ds(bwd_base, B), :]
        # one (B,H)x(H,4H) matmul per direction — no unused half, no direction select
        gh_f = jnp.dot(h[0:B].astype(jnp.bfloat16), whh_f,
                       preferred_element_type=jnp.float32)
        gh_b = jnp.dot(h[B:B2].astype(jnp.bfloat16), whh_b,
                       preferred_element_type=jnp.float32)
        gates = jnp.concatenate([gx_f + gh_f, gx_b + gh_b], axis=0)   # (2B, 4H)
        if gates_aligned:
            # 128-aligned gate slices: EUP work only where it is needed
            i_g = jax.nn.sigmoid(gates[:, 0:H])
            f_g = jax.nn.sigmoid(gates[:, H:2 * H])
            g_g = jnp.tanh(gates[:, 2 * H:3 * H])
            o_g = jax.nn.sigmoid(gates[:, 3 * H:4 * H])
        else:
            # small H: two full-width EUP pushes + one select beat misaligned slices
            sg = jax.nn.sigmoid(gates)
            tg = jnp.tanh(gates)
            act = jnp.where(g_slot, tg, sg)
            i_g = act[:, 0:H]
            f_g = act[:, H:2 * H]
            g_g = act[:, 2 * H:3 * H]
            o_g = act[:, 3 * H:4 * H]
        c_new = f_g * c + i_g * g_g
        h_new = o_g * jnp.tanh(c_new)
        m_new = jnp.maximum(m, h_new)
        return h_new, c_new, m_new

    # full unroll only for short chunks; partial unroll keeps LLO cross-iteration
    # overlap without the vreg-pressure / IMEM cliff at production T.
    unroll = True if t_chunk <= 16 else 4
    h, c, m = lax.fori_loop(0, t_chunk, step,
                            (h_ref[...], c_ref[...], m_ref[...]), unroll=unroll)
    h_ref[...] = h
    c_ref[...] = c
    m_ref[...] = m

    @pl.when(chunk == n_chunks - 1)
    def _():
        # rows 0:B = max_t h_fwd, rows B:2B = max_t h_bwd -> one lane-dense store.
        out_ref[...] = jnp.concatenate([m[0:B, :], m[B:B2, :]], axis=-1)


def model_forward(token_ids, emb_table, params):
    """token_ids: (T, B) int32 ; emb_table: (V, D) bf16 ; returns (B, 2H) f32."""
    T, B = token_ids.shape
    D = emb_table.shape[1]
    H = params["whh_f"].shape[0]      # per-direction hidden size
    fourH = 4 * H

    # Embedding gather straight in bf16 (plain-JAX glue; no f32 (T,B,D) intermediate,
    # no duplicated / time-reversed activation copy).
    emb = emb_table[token_ids]                                # (T, B, D) bf16
    # TODO(synk): nn.Dropout(0.3) only acts in train mode; eval-mode identity here.

    # Pad batch to a sublane multiple (2*B_pad then a multiple of 16) and D to a lane
    # multiple; zero padding is inert in the projection and padded rows are sliced off.
    B_pad = ((max(B, 8) + 7) // 8) * 8
    D_pad = ((D + 127) // 128) * 128
    if (B_pad, D_pad) != (B, D):
        emb = jnp.pad(emb, ((0, 0), (0, B_pad - B), (0, D_pad - D)))
    x2d = emb.reshape(T * B_pad, D_pad)                       # single x copy; both dirs read it

    wih_f = jnp.pad(params["wih_f"], ((0, D_pad - D), (0, 0))).astype(jnp.bfloat16)  # (D_pad,4H)
    wih_b = jnp.pad(params["wih_b"], ((0, D_pad - D), (0, 0))).astype(jnp.bfloat16)
    whh_f = params["whh_f"].astype(jnp.bfloat16)                                     # (H,4H)
    whh_b = params["whh_b"].astype(jnp.bfloat16)
    b_f = params["b_f"]                                                              # (1,4H) f32
    b_b = params["b_b"]

    # T-chunking: stream x chunk-by-chunk through the grid (auto double-buffered);
    # recurrent carry lives in persistent VMEM scratch.
    target_rows = 512
    t_chunk = 1
    for d in range(T, 0, -1):
        if T % d == 0 and d * B_pad <= max(target_rows, B_pad):
            t_chunk = d
            break
    n_chunks = T // t_chunk
    CH = t_chunk * B_pad

    lane = lambda n: ((n + 127) // 128) * 128
    vmem_est = (
        2 * 2 * CH * D_pad * 2                 # two streamed x chunks, double-buffered (bf16)
        + 2 * 2 * D_pad * lane(fourH) * 2      # W_ih fwd/bwd
        + 2 * 2 * max(H, 8) * lane(fourH) * 2  # W_hh fwd/bwd
        + 2 * 2 * 8 * lane(fourH) * 4          # biases (sublane padded)
        + 2 * CH * lane(fourH) * 4             # per-chunk input-gate scratch (fwd + bwd)
        + 3 * 2 * B_pad * lane(H) * 4          # h / c / running-max carries
        + 2 * B_pad * lane(2 * H) * 4          # resident output block
    )
    vmem_limit = int(min(96 * 1024 * 1024, 2 * vmem_est + (2 << 20)))

    const = lambda i: (0, 0)
    out_pad = pl.pallas_call(
        bilstm_max_kernel,
        out_shape=jax.ShapeDtypeStruct((B_pad, 2 * H), jnp.float32),
        grid=(n_chunks,),
        in_specs=[
            pl.BlockSpec((CH, D_pad), lambda i: (i, 0)),                   # fwd-time x chunk
            pl.BlockSpec((CH, D_pad), lambda i: (n_chunks - 1 - i, 0)),    # bwd-time x chunk
            pl.BlockSpec((D_pad, fourH), const),
            pl.BlockSpec((D_pad, fourH), const),
            pl.BlockSpec((H, fourH), const),
            pl.BlockSpec((H, fourH), const),
            pl.BlockSpec((1, fourH), const),
            pl.BlockSpec((1, fourH), const),
        ],
        out_specs=pl.BlockSpec((B_pad, 2 * H), const),
        scratch_shapes=[
            pltpu.VMEM((2 * B_pad, H), jnp.float32),     # h   (rows 0:B fwd, B:2B bwd)
            pltpu.VMEM((2 * B_pad, H), jnp.float32),     # c
            pltpu.VMEM((2 * B_pad, H), jnp.float32),     # running max over time
            pltpu.VMEM((CH, fourH), jnp.float32),        # fwd input gates for this chunk
            pltpu.VMEM((CH, fourH), jnp.float32),        # bwd input gates for this chunk
        ],
        compiler_params=pltpu.CompilerParams(
            dimension_semantics=("arbitrary",),          # sequential carry over T-chunks
            vmem_limit_bytes=vmem_limit,
        ),
    )(x2d, x2d, wih_f, wih_b, whh_f, whh_b, b_f, b_b)
    # TODO(synk): on v7x additionally split the two (independent) directions across the two
    # TensorCores: grid=(2, n_chunks) with dimension_semantics=("parallel", "arbitrary").
    return out_pad[:B]


def init_params(key, emb_dim, hidden_size, vocab_size):
    """Deterministic synthetic parameters, PyTorch-like uniform(-1/sqrt(H), 1/sqrt(H))."""
    H = hidden_size // 2  # per-direction hidden size (bidirectional=True)
    bound = 1.0 / jnp.sqrt(jnp.float32(H))
    keys = jax.random.split(key, 10)

    def u(k, shape):
        return jax.random.uniform(k, shape, jnp.float32, -bound, bound)

    # Embedding table stored in bf16 so the per-call gather is a single bf16 HBM pass.
    emb_table = (jax.random.normal(keys[0], (vocab_size, emb_dim), jnp.float32) * 0.1
                 ).astype(jnp.bfloat16)

    params = {}
    for d, off in (("f", 1), ("b", 5)):
        w_ih = u(keys[off + 0], (4 * H, emb_dim))   # PyTorch layout (4H, D), gate order i,f,g,o
        w_hh = u(keys[off + 1], (4 * H, H))         # PyTorch layout (4H, H)
        b_ih = u(keys[off + 2], (4 * H,))
        b_hh = u(keys[off + 3], (4 * H,))
        params[f"wih_{d}"] = w_ih.T                 # (D, 4H)
        params[f"whh_{d}"] = w_hh.T                 # (H, 4H)
        params[f"b_{d}"] = (b_ih + b_hh).reshape(1, 4 * H)
    return emb_table, params


if __name__ == "__main__":
    # Small shapes consistent with the module: seq=8, batch=2, emb_dim=32,
    # hidden_size=64 (per-direction H=32, gates 4H=128 lanes per direction).
    T, B, D = 8, 2, 32
    HIDDEN_SIZE = 64
    VOCAB = 50

    key = jax.random.PRNGKey(0)
    k_tok, k_par = jax.random.split(key)
    emb_table, params = init_params(k_par, D, HIDDEN_SIZE, VOCAB)
    token_ids = jax.random.randint(k_tok, (T, B), 0, VOCAB, jnp.int32)

    out = model_forward(token_ids, emb_table, params)
    out = jax.block_until_ready(out)
    assert out.shape == (B, HIDDEN_SIZE)
    print("KERNEL_OK")
</pallas_src>

<mosaic_0001>
module attributes {stable_mosaic.version = 11 : i64} {
  func.func @bilstm_max_kernel(%arg0: i32, %arg1: memref<64x128xbf16, #tpu.memory_space<vmem>>, %arg2: memref<64x128xbf16, #tpu.memory_space<vmem>>, %arg3: memref<128x128xbf16, #tpu.memory_space<vmem>>, %arg4: memref<128x128xbf16, #tpu.memory_space<vmem>>, %arg5: memref<32x128xbf16, #tpu.memory_space<vmem>>, %arg6: memref<32x128xbf16, #tpu.memory_space<vmem>>, %arg7: memref<1x128xf32, #tpu.memory_space<vmem>>, %arg8: memref<1x128xf32, #tpu.memory_space<vmem>>, %arg9: memref<8x64xf32, #tpu.memory_space<vmem>>, %arg10: memref<16x32xf32, #tpu.memory_space<vmem>>, %arg11: memref<16x32xf32, #tpu.memory_space<vmem>>, %arg12: memref<16x32xf32, #tpu.memory_space<vmem>>, %arg13: memref<64x128xf32, #tpu.memory_space<vmem>>, %arg14: memref<64x128xf32, #tpu.memory_space<vmem>>) attributes {dimension_semantics = [#tpu.dimension_semantics<arbitrary>], iteration_bounds = array<i64: 1>, scalar_prefetch = 0 : i64, scratch_operands = 5 : i64, tpu.core_type = #tpu.core_type<tc>, window_params = [{transform_indices = @transform_0, window_bounds = array<i64: 64, 128>}, {transform_indices = @transform_1, window_bounds = array<i64: 64, 128>}, {pipeline_mode = #tpu.pipeline_mode<synchronous>, transform_indices = @transform_2, window_bounds = array<i64: 128, 128>}, {pipeline_mode = #tpu.pipeline_mode<synchronous>, transform_indices = @transform_3, window_bounds = array<i64: 128, 128>}, {pipeline_mode = #tpu.pipeline_mode<synchronous>, transform_indices = @transform_4, window_bounds = array<i64: 32, 128>}, {pipeline_mode = #tpu.pipeline_mode<synchronous>, transform_indices = @transform_5, window_bounds = array<i64: 32, 128>}, {pipeline_mode = #tpu.pipeline_mode<synchronous>, transform_indices = @transform_6, window_bounds = array<i64: 1, 128>}, {pipeline_mode = #tpu.pipeline_mode<synchronous>, transform_indices = @transform_7, window_bounds = array<i64: 1, 128>}, {pipeline_mode = #tpu.pipeline_mode<synchronous>, transform_indices = @transform_8, window_bounds = array<i64: 8, 64>}]} {
    %c0_i32 = arith.constant 0 : i32
    %0 = arith.cmpi eq, %arg0, %c0_i32 : i32
    %1 = arith.extui %0 : i1 to i32
    %c0_i32_0 = arith.constant 0 : i32
    %2 = arith.cmpi ne, %1, %c0_i32_0 : i32
    scf.if %2 {
      %cst_100 = arith.constant 0.000000e+00 : f32
      %314 = vector.broadcast %cst_100 : f32 to vector<16x32xf32>
      %c0_101 = arith.constant 0 : index
      %c0_102 = arith.constant 0 : index
      %315 = vector.load %arg10[%c0_101, %c0_102] : memref<16x32xf32, #tpu.memory_space<vmem>>, vector<16x32xf32>
      tpu.vector_store %arg10[%c0_101, %c0_102], %314 {strides = array<i32>} : memref<16x32xf32, #tpu.memory_space<vmem>>, vector<16x32xf32>,
      %cst_103 = arith.constant 0.000000e+00 : f32
      %316 = vector.broadcast %cst_103 : f32 to vector<16x32xf32>
      %c0_104 = arith.constant 0 : index
      %c0_105 = arith.constant 0 : index
      %317 = vector.load %arg11[%c0_104, %c0_105] : memref<16x32xf32, #tpu.memory_space<vmem>>, vector<16x32xf32>
      tpu.vector_store %arg11[%c0_104, %c0_105], %316 {strides = array<i32>} : memref<16x32xf32, #tpu.memory_space<vmem>>, vector<16x32xf32>,
      %cst_106 = arith.constant 0xFF800000 : f32
      %318 = vector.broadcast %cst_106 : f32 to vector<16x32xf32>
      %c0_107 = arith.constant 0 : index
      %c0_108 = arith.constant 0 : index
      %319 = vector.load %arg12[%c0_107, %c0_108] : memref<16x32xf32, #tpu.memory_space<vmem>>, vector<16x32xf32>
      tpu.vector_store %arg12[%c0_107, %c0_108], %318 {strides = array<i32>} : memref<16x32xf32, #tpu.memory_space<vmem>>, vector<16x32xf32>,
    } else {
    }
    %c0 = arith.constant 0 : index
    %c0_1 = arith.constant 0 : index
    %3 = vector.load %arg1[%c0, %c0_1] : memref<64x128xbf16, #tpu.memory_space<vmem>>, vector<64x128xbf16>
    %c0_2 = arith.constant 0 : index
    %c0_3 = arith.constant 0 : index
    %4 = vector.load %arg3[%c0_2, %c0_3] : memref<128x128xbf16, #tpu.memory_space<vmem>>, vector<128x128xbf16>
    %cst = arith.constant dense<0.000000e+00> : vector<64x128xf32>
    %5 = tpu.matmul %3, %4, %cst {dimension_numbers = #tpu.dot_dimension_numbers<[1], [0], [0], [1], [0, 0, 1, 1], [], []>} : vector<64x128xbf16>, vector<128x128xbf16>, vector<64x128xf32> -> vector<64x128xf32>
    %c0_4 = arith.constant 0 : index
    %c0_5 = arith.constant 0 : index
    %6 = vector.load %arg7[%c0_4, %c0_5] : memref<1x128xf32, #tpu.memory_space<vmem>>, vector<1x128xf32>
    %7 = vector.broadcast %6 : vector<1x128xf32> to vector<64x128xf32>
    %8 = arith.addf %5, %7 : vector<64x128xf32>
    %c0_6 = arith.constant 0 : index
    %c0_7 = arith.constant 0 : index
    %9 = vector.load %arg13[%c0_6, %c0_7] : memref<64x128xf32, #tpu.memory_space<vmem>>, vector<64x128xf32>
    tpu.vector_store %arg13[%c0_6, %c0_7], %8 {strides = array<i32>} : memref<64x128xf32, #tpu.memory_space<vmem>>, vector<64x128xf32>,
    %c0_8 = arith.constant 0 : index
    %c0_9 = arith.constant 0 : index
    %10 = vector.load %arg2[%c0_8, %c0_9] : memref<64x128xbf16, #tpu.memory_space<vmem>>, vector<64x128xbf16>
    %c0_10 = arith.constant 0 : index
    %c0_11 = arith.constant 0 : index
    %11 = vector.load %arg4[%c0_10, %c0_11] : memref<128x128xbf16, #tpu.memory_space<vmem>>, vector<128x128xbf16>
    %cst_12 = arith.constant dense<0.000000e+00> : vector<64x128xf32>
    %12 = tpu.matmul %10, %11, %cst_12 {dimension_numbers = #tpu.dot_dimension_numbers<[1], [0], [0], [1], [0, 0, 1, 1], [], []>} : vector<64x128xbf16>, vector<128x128xbf16>, vector<64x128xf32> -> vector<64x128xf32>
    %c0_13 = arith.constant 0 : index
    %c0_14 = arith.constant 0 : index
    %13 = vector.load %arg8[%c0_13, %c0_14] : memref<1x128xf32, #tpu.memory_space<vmem>>, vector<1x128xf32>
    %14 = vector.broadcast %13 : vector<1x128xf32> to vector<64x128xf32>
    %15 = arith.addf %12, %14 : vector<64x128xf32>
    %c0_15 = arith.constant 0 : index
    %c0_16 = arith.constant 0 : index
    %16 = vector.load %arg14[%c0_15, %c0_16] : memref<64x128xf32, #tpu.memory_space<vmem>>, vector<64x128xf32>
    tpu.vector_store %arg14[%c0_15, %c0_16], %15 {strides = array<i32>} : memref<64x128xf32, #tpu.memory_space<vmem>>, vector<64x128xf32>,
    %c0_17 = arith.constant 0 : index
    %c0_18 = arith.constant 0 : index
    %17 = vector.load %arg5[%c0_17, %c0_18] : memref<32x128xbf16, #tpu.memory_space<vmem>>, vector<32x128xbf16>
    %c0_19 = arith.constant 0 : index
    %c0_20 = arith.constant 0 : index
    %18 = vector.load %arg6[%c0_19, %c0_20] : memref<32x128xbf16, #tpu.memory_space<vmem>>, vector<32x128xbf16>
    %19 = tpu.iota {dimensions = array<i32: 1>} : vector<16x128xi32>
    %c64_i32 = arith.constant 64 : i32
    %20 = vector.broadcast %c64_i32 : i32 to vector<16x128xi32>
    %21 = arith.cmpi sge, %19, %20 : vector<16x128xi32>
    %c96_i32 = arith.constant 96 : i32
    %22 = vector.broadcast %c96_i32 : i32 to vector<16x128xi32>
    %23 = arith.cmpi slt, %19, %22 : vector<16x128xi32>
    %24 = arith.andi %21, %23 : vector<16x128xi1>
    %c0_21 = arith.constant 0 : index
    %c0_22 = arith.constant 0 : index
    %25 = vector.load %arg10[%c0_21, %c0_22] : memref<16x32xf32, #tpu.memory_space<vmem>>, vector<16x32xf32>
    %c0_23 = arith.constant 0 : index
    %c0_24 = arith.constant 0 : index
    %26 = vector.load %arg11[%c0_23, %c0_24] : memref<16x32xf32, #tpu.memory_space<vmem>>, vector<16x32xf32>
    %c0_25 = arith.constant 0 : index
    %c0_26 = arith.constant 0 : index
    %27 = vector.load %arg12[%c0_25, %c0_26] : memref<16x32xf32, #tpu.memory_space<vmem>>, vector<16x32xf32>
    %c0_i32_27 = arith.constant 0 : i32
    %c8_i32 = arith.constant 8 : i32
    %28 = arith.muli %c0_i32_27, %c8_i32 : i32
    %29 = tpu.assume_multiple %28, 8 : i32
    %c7_i32 = arith.constant 7 : i32
    %30 = arith.subi %c7_i32, %c0_i32_27 : i32
    %c8_i32_28 = arith.constant 8 : i32
    %31 = arith.muli %30, %c8_i32_28 : i32
    %32 = tpu.assume_multiple %31, 8 : i32
    %33 = arith.index_cast %29 : i32 to index
    %c0_29 = arith.constant 0 : index
    %34 = vector.load %arg13[%33, %c0_29] : memref<64x128xf32, #tpu.memory_space<vmem>>, vector<8x128xf32>
    %35 = arith.index_cast %32 : i32 to index
    %c0_30 = arith.constant 0 : index
    %36 = vector.load %arg14[%35, %c0_30] : memref<64x128xf32, #tpu.memory_space<vmem>>, vector<8x128xf32>
    %37 = vector.extract_strided_slice %25 {offsets = [0, 0], sizes = [8, 32], strides = [1, 1]} : vector<16x32xf32> to vector<8x32xf32>
    %38 = arith.truncf %37 : vector<8x32xf32> to vector<8x32xbf16>
    %cst_31 = arith.constant dense<0.000000e+00> : vector<8x128xf32>
    %39 = tpu.matmul %38, %17, %cst_31 {dimension_numbers = #tpu.dot_dimension_numbers<[1], [0], [0], [1], [0, 0, 1, 1], [], []>} : vector<8x32xbf16>, vector<32x128xbf16>, vector<8x128xf32> -> vector<8x128xf32>
    %40 = vector.extract_strided_slice %25 {offsets = [8, 0], sizes = [8, 32], strides = [1, 1]} : vector<16x32xf32> to vector<8x32xf32>
    %41 = arith.truncf %40 : vector<8x32xf32> to vector<8x32xbf16>
    %cst_32 = arith.constant dense<0.000000e+00> : vector<8x128xf32>
    %42 = tpu.matmul %41, %18, %cst_32 {dimension_numbers = #tpu.dot_dimension_numbers<[1], [0], [0], [1], [0, 0, 1, 1], [], []>} : vector<8x32xbf16>, vector<32x128xbf16>, vector<8x128xf32> -> vector<8x128xf32>
    %43 = arith.addf %34, %39 : vector<8x128xf32>
    %44 = arith.addf %36, %42 : vector<8x128xf32>
    %45 = tpu.concatenate %43, %44 in 0 : vector<8x128xf32>, vector<8x128xf32> -> vector<16x128xf32>
    %46 = arith.negf %45 : vector<16x128xf32>
    %47 = math.exp %46 : vector<16x128xf32>
    %cst_33 = arith.constant 1.000000e+00 : f32
    %48 = vector.broadcast %cst_33 : f32 to vector<16x128xf32>
    %49 = arith.addf %48, %47 : vector<16x128xf32>
    %50 = arith.divf %48, %49 : vector<16x128xf32>
    %51 = math.tanh %45 : vector<16x128xf32>
    %52 = arith.select %24, %51, %50 : vector<16x128xi1>, vector<16x128xf32>
    %53 = vector.extract_strided_slice %52 {offsets = [0, 0], sizes = [16, 32], strides = [1, 1]} : vector<16x128xf32> to vector<16x32xf32>
    %54 = vector.extract_strided_slice %52 {offsets = [0, 32], sizes = [16, 32], strides = [1, 1]} : vector<16x128xf32> to vector<16x32xf32>
    %55 = vector.extract_strided_slice %52 {offsets = [0, 64], sizes = [16, 32], strides = [1, 1]} : vector<16x128xf32> to vector<16x32xf32>
    %56 = vector.extract_strided_slice %52 {offsets = [0, 96], sizes = [16, 32], strides = [1, 1]} : vector<16x128xf32> to vector<16x32xf32>
    %57 = arith.mulf %54, %26 : vector<16x32xf32>
    %58 = arith.mulf %53, %55 : vector<16x32xf32>
    %59 = arith.addf %57, %58 : vector<16x32xf32>
    %60 = math.tanh %59 : vector<16x32xf32>
    %61 = arith.mulf %56, %60 : vector<16x32xf32>
    %62 = arith.maximumf %27, %61 : vector<16x32xf32>
    %c1_i32 = arith.constant 1 : i32
    %c8_i32_34 = arith.constant 8 : i32
    %63 = arith.muli %c1_i32, %c8_i32_34 : i32
    %64 = tpu.assume_multiple %63, 8 : i32
    %c7_i32_35 = arith.constant 7 : i32
    %65 = arith.subi %c7_i32_35, %c1_i32 : i32
    %c8_i32_36 = arith.constant 8 : i32
    %66 = arith.muli %65, %c8_i32_36 : i32
    %67 = tpu.assume_multiple %66, 8 : i32
    %68 = arith.index_cast %64 : i32 to index
    %c0_37 = arith.constant 0 : index
    %69 = vector.load %arg13[%68, %c0_37] : memref<64x128xf32, #tpu.memory_space<vmem>>, vector<8x128xf32>
    %70 = arith.index_cast %67 : i32 to index
    %c0_38 = arith.constant 0 : index
    %71 = vector.load %arg14[%70, %c0_38] : memref<64x128xf32, #tpu.memory_space<vmem>>, vector<8x128xf32>
    %72 = vector.extract_strided_slice %61 {offsets = [0, 0], sizes = [8, 32], strides = [1, 1]} : vector<16x32xf32> to vector<8x32xf32>
    %73 = arith.truncf %72 : vector<8x32xf32> to vector<8x32xbf16>
    %cst_39 = arith.constant dense<0.000000e+00> : vector<8x128xf32>
    %74 = tpu.matmul %73, %17, %cst_39 {dimension_numbers = #tpu.dot_dimension_numbers<[1], [0], [0], [1], [0, 0, 1, 1], [], []>} : vector<8x32xbf16>, vector<32x128xbf16>, vector<8x128xf32> -> vector<8x128xf32>
    %75 = vector.extract_strided_slice %61 {offsets = [8, 0], sizes = [8, 32], strides = [1, 1]} : vector<16x32xf32> to vector<8x32xf32>
    %76 = arith.truncf %75 : vector<8x32xf32> to vector<8x32xbf16>
    %cst_40 = arith.constant dense<0.000000e+00> : vector<8x128xf32>
    %77 = tpu.matmul %76, %18, %cst_40 {dimension_numbers = #tpu.dot_dimension_numbers<[1], [0], [0], [1], [0, 0, 1, 1], [], []>} : vector<8x32xbf16>, vector<32x128xbf16>, vector<8x128xf32> -> vector<8x128xf32>
    %78 = arith.addf %69, %74 : vector<8x128xf32>
    %79 = arith.addf %71, %77 : vector<8x128xf32>
    %80 = tpu.concatenate %78, %79 in 0 : vector<8x128xf32>, vector<8x128xf32> -> vector<16x128xf32>
    %81 = arith.negf %80 : vector<16x128xf32>
    %82 = math.exp %81 : vector<16x128xf32>
    %cst_41 = arith.constant 1.000000e+00 : f32
    %83 = vector.broadcast %cst_41 : f32 to vector<16x128xf32>
    %84 = arith.addf %83, %82 : vector<16x128xf32>
    %85 = arith.divf %83, %84 : vector<16x128xf32>
    %86 = math.tanh %80 : vector<16x128xf32>
    %87 = arith.select %24, %86, %85 : vector<16x128xi1>, vector<16x128xf32>
    %88 = vector.extract_strided_slice %87 {offsets = [0, 0], sizes = [16, 32], strides = [1, 1]} : vector<16x128xf32> to vector<16x32xf32>
    %89 = vector.extract_strided_slice %87 {offsets = [0, 32], sizes = [16, 32], strides = [1, 1]} : vector<16x128xf32> to vector<16x32xf32>
    %90 = vector.extract_strided_slice %87 {offsets = [0, 64], sizes = [16, 32], strides = [1, 1]} : vector<16x128xf32> to vector<16x32xf32>
    %91 = vector.extract_strided_slice %87 {offsets = [0, 96], sizes = [16, 32], strides = [1, 1]} : vector<16x128xf32> to vector<16x32xf32>
    %92 = arith.mulf %89, %59 : vector<16x32xf32>
    %93 = arith.mulf %88, %90 : vector<16x32xf32>
    %94 = arith.addf %92, %93 : vector<16x32xf32>
    %95 = math.tanh %94 : vector<16x32xf32>
    %96 = arith.mulf %91, %95 : vector<16x32xf32>
    %97 = arith.maximumf %62, %96 : vector<16x32xf32>
    %c2_i32 = arith.constant 2 : i32
    %c8_i32_42 = arith.constant 8 : i32
    %98 = arith.muli %c2_i32, %c8_i32_42 : i32
    %99 = tpu.assume_multiple %98, 8 : i32
    %c7_i32_43 = arith.constant 7 : i32
    %100 = arith.subi %c7_i32_43, %c2_i32 : i32
    %c8_i32_44 = arith.constant 8 : i32
    %101 = arith.muli %100, %c8_i32_44 : i32
    %102 = tpu.assume_multiple %101, 8 : i32
    %103 = arith.index_cast %99 : i32 to index
    %c0_45 = arith.constant 0 : index
    %104 = vector.load %arg13[%103, %c0_45] : memref<64x128xf32, #tpu.memory_space<vmem>>, vector<8x128xf32>
    %105 = arith.index_cast %102 : i32 to index
    %c0_46 = arith.constant 0 : index
    %106 = vector.load %arg14[%105, %c0_46] : memref<64x128xf32, #tpu.memory_space<vmem>>, vector<8x128xf32>
    %107 = vector.extract_strided_slice %96 {offsets = [0, 0], sizes = [8, 32], strides = [1, 1]} : vector<16x32xf32> to vector<8x32xf32>
    %108 = arith.truncf %107 : vector<8x32xf32> to vector<8x32xbf16>
    %cst_47 = arith.constant dense<0.000000e+00> : vector<8x128xf32>
    %109 = tpu.matmul %108, %17, %cst_47 {dimension_numbers = #tpu.dot_dimension_numbers<[1], [0], [0], [1], [0, 0, 1, 1], [], []>} : vector<8x32xbf16>, vector<32x128xbf16>, vector<8x128xf32> -> vector<8x128xf32>
    %110 = vector.extract_strided_slice %96 {offsets = [8, 0], sizes = [8, 32], strides = [1, 1]} : vector<16x32xf32> to vector<8x32xf32>
    %111 = arith.truncf %110 : vector<8x32xf32> to vector<8x32xbf16>
    %cst_48 = arith.constant dense<0.000000e+00> : vector<8x128xf32>
    %112 = tpu.matmul %111, %18, %cst_48 {dimension_numbers = #tpu.dot_dimension_numbers<[1], [0], [0], [1], [0, 0, 1, 1], [], []>} : vector<8x32xbf16>, vector<32x128xbf16>, vector<8x128xf32> -> vector<8x128xf32>
    %113 = arith.addf %104, %109 : vector<8x128xf32>
    %114 = arith.addf %106, %112 : vector<8x128xf32>
    %115 = tpu.concatenate %113, %114 in 0 : vector<8x128xf32>, vector<8x128xf32> -> vector<16x128xf32>
    %116 = arith.negf %115 : vector<16x128xf32>
    %117 = math.exp %116 : vector<16x128xf32>
    %cst_49 = arith.constant 1.000000e+00 : f32
    %118 = vector.broadcast %cst_49 : f32 to vector<16x128xf32>
    %119 = arith.addf %118, %117 : vector<16x128xf32>
    %120 = arith.divf %118, %119 : vector<16x128xf32>
    %121 = math.tanh %115 : vector<16x128xf32>
    %122 = arith.select %24, %121, %120 : vector<16x128xi1>, vector<16x128xf32>
    %123 = vector.extract_strided_slice %122 {offsets = [0, 0], sizes = [16, 32], strides = [1, 1]} : vector<16x128xf32> to vector<16x32xf32>
    %124 = vector.extract_strided_slice %122 {offsets = [0, 32], sizes = [16, 32], strides = [1, 1]} : vector<16x128xf32> to vector<16x32xf32>
    %125 = vector.extract_strided_slice %122 {offsets = [0, 64], sizes = [16, 32], strides = [1, 1]} : vector<16x128xf32> to vector<16x32xf32>
    %126 = vector.extract_strided_slice %122 {offsets = [0, 96], sizes = [16, 32], strides = [1, 1]} : vector<16x128xf32> to vector<16x32xf32>
    %127 = arith.mulf %124, %94 : vector<16x32xf32>
    %128 = arith.mulf %123, %125 : vector<16x32xf32>
    %129 = arith.addf %127, %128 : vector<16x32xf32>
    %130 = math.tanh %129 : vector<16x32xf32>
    %131 = arith.mulf %126, %130 : vector<16x32xf32>
    %132 = arith.maximumf %97, %131 : vector<16x32xf32>
    %c3_i32 = arith.constant 3 : i32
    %c8_i32_50 = arith.constant 8 : i32
    %133 = arith.muli %c3_i32, %c8_i32_50 : i32
    %134 = tpu.assume_multiple %133, 8 : i32
    %c7_i32_51 = arith.constant 7 : i32
    %135 = arith.subi %c7_i32_51, %c3_i32 : i32
    %c8_i32_52 = arith.constant 8 : i32
    %136 = arith.muli %135, %c8_i32_52 : i32
    %137 = tpu.assume_multiple %136, 8 : i32
    %138 = arith.index_cast %134 : i32 to index
    %c0_53 = arith.constant 0 : index
    %139 = vector.load %arg13[%138, %c0_53] : memref<64x128xf32, #tpu.memory_space<vmem>>, vector<8x128xf32>
    %140 = arith.index_cast %137 : i32 to index
    %c0_54 = arith.constant 0 : index
    %141 = vector.load %arg14[%140, %c0_54] : memref<64x128xf32, #tpu.memory_space<vmem>>, vector<8x128xf32>
    %142 = vector.extract_strided_slice %131 {offsets = [0, 0], sizes = [8, 32], strides = [1, 1]} : vector<16x32xf32> to vector<8x32xf32>
    %143 = arith.truncf %142 : vector<8x32xf32> to vector<8x32xbf16>
    %cst_55 = arith.constant dense<0.000000e+00> : vector<8x128xf32>
    %144 = tpu.matmul %143, %17, %cst_55 {dimension_numbers = #tpu.dot_dimension_numbers<[1], [0], [0], [1], [0, 0, 1, 1], [], []>} : vector<8x32xbf16>, vector<32x128xbf16>, vector<8x128xf32> -> vector<8x128xf32>
    %145 = vector.extract_strided_slice %131 {offsets = [8, 0], sizes = [8, 32], strides = [1, 1]} : vector<16x32xf32> to vector<8x32xf32>
    %146 = arith.truncf %145 : vector<8x32xf32> to vector<8x32xbf16>
    %cst_56 = arith.constant dense<0.000000e+00> : vector<8x128xf32>
    %147 = tpu.matmul %146, %18, %cst_56 {dimension_numbers = #tpu.dot_dimension_numbers<[1], [0], [0], [1], [0, 0, 1, 1], [], []>} : vector<8x32xbf16>, vector<32x128xbf16>, vector<8x128xf32> -> vector<8x128xf32>
    %148 = arith.addf %139, %144 : vector<8x128xf32>
    %149 = arith.addf %141, %147 : vector<8x128xf32>
    %150 = tpu.concatenate %148, %149 in 0 : vector<8x128xf32>, vector<8x128xf32> -> vector<16x128xf32>
    %151 = arith.negf %150 : vector<16x128xf32>
    %152 = math.exp %151 : vector<16x128xf32>
    %cst_57 = arith.constant 1.000000e+00 : f32
    %153 = vector.broadcast %cst_57 : f32 to vector<16x128xf32>
    %154 = arith.addf %153, %152 : vector<16x128xf32>
    %155 = arith.divf %153, %154 : vector<16x128xf32>
    %156 = math.tanh %150 : vector<16x128xf32>
    %157 = arith.select %24, %156, %155 : vector<16x128xi1>, vector<16x128xf32>
    %158 = vector.extract_strided_slice %157 {offsets = [0, 0], sizes = [16, 32], strides = [1, 1]} : vector<16x128xf32> to vector<16x32xf32>
    %159 = vector.extract_strided_slice %157 {offsets = [0, 32], sizes = [16, 32], strides = [1, 1]} : vector<16x128xf32> to vector<16x32xf32>
    %160 = vector.extract_strided_slice %157 {offsets = [0, 64], sizes = [16, 32], strides = [1, 1]} : vector<16x128xf32> to vector<16x32xf32>
    %161 = vector.extract_strided_slice %157 {offsets = [0, 96], sizes = [16, 32], strides = [1, 1]} : vector<16x128xf32> to vector<16x32xf32>
    %162 = arith.mulf %159, %129 : vector<16x32xf32>
    %163 = arith.mulf %158, %160 : vector<16x32xf32>
    %164 = arith.addf %162, %163 : vector<16x32xf32>
    %165 = math.tanh %164 : vector<16x32xf32>
    %166 = arith.mulf %161, %165 : vector<16x32xf32>
    %167 = arith.maximumf %132, %166 : vector<16x32xf32>
    %c4_i32 = arith.constant 4 : i32
    %c8_i32_58 = arith.constant 8 : i32
    %168 = arith.muli %c4_i32, %c8_i32_58 : i32
    %169 = tpu.assume_multiple %168, 8 : i32
    %c7_i32_59 = arith.constant 7 : i32
    %170 = arith.subi %c7_i32_59, %c4_i32 : i32
    %c8_i32_60 = arith.constant 8 : i32
    %171 = arith.muli %170, %c8_i32_60 : i32
    %172 = tpu.assume_multiple %171, 8 : i32
    %173 = arith.index_cast %169 : i32 to index
    %c0_61 = arith.constant 0 : index
    %174 = vector.load %arg13[%173, %c0_61] : memref<64x128xf32, #tpu.memory_space<vmem>>, vector<8x128xf32>
    %175 = arith.index_cast %172 : i32 to index
    %c0_62 = arith.constant 0 : index
    %176 = vector.load %arg14[%175, %c0_62] : memref<64x128xf32, #tpu.memory_space<vmem>>, vector<8x128xf32>
    %177 = vector.extract_strided_slice %166 {offsets = [0, 0], sizes = [8, 32], strides = [1, 1]} : vector<16x32xf32> to vector<8x32xf32>
    %178 = arith.truncf %177 : vector<8x32xf32> to vector<8x32xbf16>
    %cst_63 = arith.constant dense<0.000000e+00> : vector<8x128xf32>
    %179 = tpu.matmul %178, %17, %cst_63 {dimension_numbers = #tpu.dot_dimension_numbers<[1], [0], [0], [1], [0, 0, 1, 1], [], []>} : vector<8x32xbf16>, vector<32x128xbf16>, vector<8x128xf32> -> vector<8x128xf32>
    %180 = vector.extract_strided_slice %166 {offsets = [8, 0], sizes = [8, 32], strides = [1, 1]} : vector<16x32xf32> to vector<8x32xf32>
    %181 = arith.truncf %180 : vector<8x32xf32> to vector<8x32xbf16>
    %cst_64 = arith.constant dense<0.000000e+00> : vector<8x128xf32>
    %182 = tpu.matmul %181, %18, %cst_64 {dimension_numbers = #tpu.dot_dimension_numbers<[1], [0], [0], [1], [0, 0, 1, 1], [], []>} : vector<8x32xbf16>, vector<32x128xbf16>, vector<8x128xf32> -> vector<8x128xf32>
    %183 = arith.addf %174, %179 : vector<8x128xf32>
    %184 = arith.addf %176, %182 : vector<8x128xf32>
    %185 = tpu.concatenate %183, %184 in 0 : vector<8x128xf32>, vector<8x128xf32> -> vector<16x128xf32>
    %186 = arith.negf %185 : vector<16x128xf32>
    %187 = math.exp %186 : vector<16x128xf32>
    %cst_65 = arith.constant 1.000000e+00 : f32
    %188 = vector.broadcast %cst_65 : f32 to vector<16x128xf32>
    %189 = arith.addf %188, %187 : vector<16x128xf32>
    %190 = arith.divf %188, %189 : vector<16x128xf32>
    %191 = math.tanh %185 : vector<16x128xf32>
    %192 = arith.select %24, %191, %190 : vector<16x128xi1>, vector<16x128xf32>
    %193 = vector.extract_strided_slice %192 {offsets = [0, 0], sizes = [16, 32], strides = [1, 1]} : vector<16x128xf32> to vector<16x32xf32>
    %194 = vector.extract_strided_slice %192 {offsets = [0, 32], sizes = [16, 32], strides = [1, 1]} : vector<16x128xf32> to vector<16x32xf32>
    %195 = vector.extract_strided_slice %192 {offsets = [0, 64], sizes = [16, 32], strides = [1, 1]} : vector<16x128xf32> to vector<16x32xf32>
    %196 = vector.extract_strided_slice %192 {offsets = [0, 96], sizes = [16, 32], strides = [1, 1]} : vector<16x128xf32> to vector<16x32xf32>
    %197 = arith.mulf %194, %164 : vector<16x32xf32>
    %198 = arith.mulf %193, %195 : vector<16x32xf32>
    %199 = arith.addf %197, %198 : vector<16x32xf32>
    %200 = math.tanh %199 : vector<16x32xf32>
    %201 = arith.mulf %196, %200 : vector<16x32xf32>
    %202 = arith.maximumf %167, %201 : vector<16x32xf32>
    %c5_i32 = arith.constant 5 : i32
    %c8_i32_66 = arith.constant 8 : i32
    %203 = arith.muli %c5_i32, %c8_i32_66 : i32
    %204 = tpu.assume_multiple %203, 8 : i32
    %c7_i32_67 = arith.constant 7 : i32
    %205 = arith.subi %c7_i32_67, %c5_i32 : i32
    %c8_i32_68 = arith.constant 8 : i32
    %206 = arith.muli %205, %c8_i32_68 : i32
    %207 = tpu.assume_multiple %206, 8 : i32
    %208 = arith.index_cast %204 : i32 to index
    %c0_69 = arith.constant 0 : index
    %209 = vector.load %arg13[%208, %c0_69] : memref<64x128xf32, #tpu.memory_space<vmem>>, vector<8x128xf32>
    %210 = arith.index_cast %207 : i32 to index
    %c0_70 = arith.constant 0 : index
    %211 = vector.load %arg14[%210, %c0_70] : memref<64x128xf32, #tpu.memory_space<vmem>>, vector<8x128xf32>
    %212 = vector.extract_strided_slice %201 {offsets = [0, 0], sizes = [8, 32], strides = [1, 1]} : vector<16x32xf32> to vector<8x32xf32>
    %213 = arith.truncf %212 : vector<8x32xf32> to vector<8x32xbf16>
    %cst_71 = arith.constant dense<0.000000e+00> : vector<8x128xf32>
    %214 = tpu.matmul %213, %17, %cst_71 {dimension_numbers = #tpu.dot_dimension_numbers<[1], [0], [0], [1], [0, 0, 1, 1], [], []>} : vector<8x32xbf16>, vector<32x128xbf16>, vector<8x128xf32> -> vector<8x128xf32>
    %215 = vector.extract_strided_slice %201 {offsets = [8, 0], sizes = [8, 32], strides = [1, 1]} : vector<16x32xf32> to vector<8x32xf32>
    %216 = arith.truncf %215 : vector<8x32xf32> to vector<8x32xbf16>
    %cst_72 = arith.constant dense<0.000000e+00> : vector<8x128xf32>
    %217 = tpu.matmul %216, %18, %cst_72 {dimension_numbers = #tpu.dot_dimension_numbers<[1], [0], [0], [1], [0, 0, 1, 1], [], []>} : vector<8x32xbf16>, vector<32x128xbf16>, vector<8x128xf32> -> vector<8x128xf32>
    %218 = arith.addf %209, %214 : vector<8x128xf32>
    %219 = arith.addf %211, %217 : vector<8x128xf32>
    %220 = tpu.concatenate %218, %219 in 0 : vector<8x128xf32>, vector<8x128xf32> -> vector<16x128xf32>
    %221 = arith.negf %220 : vector<16x128xf32>
    %222 = math.exp %221 : vector<16x128xf32>
    %cst_73 = arith.constant 1.000000e+00 : f32
    %223 = vector.broadcast %cst_73 : f32 to vector<16x128xf32>
    %224 = arith.addf %223, %222 : vector<16x128xf32>
    %225 = arith.divf %223, %224 : vector<16x128xf32>
    %226 = math.tanh %220 : vector<16x128xf32>
    %227 = arith.select %24, %226, %225 : vector<16x128xi1>, vector<16x128xf32>
    %228 = vector.extract_strided_slice %227 {offsets = [0, 0], sizes = [16, 32], strides = [1, 1]} : vector<16x128xf32> to vector<16x32xf32>
    %229 = vector.extract_strided_slice %227 {offsets = [0, 32], sizes = [16, 32], strides = [1, 1]} : vector<16x128xf32> to vector<16x32xf32>
    %230 = vector.extract_strided_slice %227 {offsets = [0, 64], sizes = [16, 32], strides = [1, 1]} : vector<16x128xf32> to vector<16x32xf32>
    %231 = vector.extract_strided_slice %227 {offsets = [0, 96], sizes = [16, 32], strides = [1, 1]} : vector<16x128xf32> to vector<16x32xf32>
    %232 = arith.mulf %229, %199 : vector<16x32xf32>
    %233 = arith.mulf %228, %230 : vector<16x32xf32>
    %234 = arith.addf %232, %233 : vector<16x32xf32>
    %235 = math.tanh %234 : vector<16x32xf32>
    %236 = arith.mulf %231, %235 : vector<16x32xf32>
    %237 = arith.maximumf %202, %236 : vector<16x32xf32>
    %c6_i32 = arith.constant 6 : i32
    %c8_i32_74 = arith.constant 8 : i32
    %238 = arith.muli %c6_i32, %c8_i32_74 : i32
    %239 = tpu.assume_multiple %238, 8 : i32
    %c7_i32_75 = arith.constant 7 : i32
    %240 = arith.subi %c7_i32_75, %c6_i32 : i32
    %c8_i32_76 = arith.constant 8 : i32
    %241 = arith.muli %240, %c8_i32_76 : i32
    %242 = tpu.assume_multiple %241, 8 : i32
    %243 = arith.index_cast %239 : i32 to index
    %c0_77 = arith.constant 0 : index
    %244 = vector.load %arg13[%243, %c0_77] : memref<64x128xf32, #tpu.memory_space<vmem>>, vector<8x128xf32>
    %245 = arith.index_cast %242 : i32 to index
    %c0_78 = arith.constant 0 : index
    %246 = vector.load %arg14[%245, %c0_78] : memref<64x128xf32, #tpu.memory_space<vmem>>, vector<8x128xf32>
    %247 = vector.extract_strided_slice %236 {offsets = [0, 0], sizes = [8, 32], strides = [1, 1]} : vector<16x32xf32> to vector<8x32xf32>
    %248 = arith.truncf %247 : vector<8x32xf32> to vector<8x32xbf16>
    %cst_79 = arith.constant dense<0.000000e+00> : vector<8x128xf32>
    %249 = tpu.matmul %248, %17, %cst_79 {dimension_numbers = #tpu.dot_dimension_numbers<[1], [0], [0], [1], [0, 0, 1, 1], [], []>} : vector<8x32xbf16>, vector<32x128xbf16>, vector<8x128xf32> -> vector<8x128xf32>
    %250 = vector.extract_strided_slice %236 {offsets = [8, 0], sizes = [8, 32], strides = [1, 1]} : vector<16x32xf32> to vector<8x32xf32>
    %251 = arith.truncf %250 : vector<8x32xf32> to vector<8x32xbf16>
    %cst_80 = arith.constant dense<0.000000e+00> : vector<8x128xf32>
    %252 = tpu.matmul %251, %18, %cst_80 {dimension_numbers = #tpu.dot_dimension_numbers<[1], [0], [0], [1], [0, 0, 1, 1], [], []>} : vector<8x32xbf16>, vector<32x128xbf16>, vector<8x128xf32> -> vector<8x128xf32>
    %253 = arith.addf %244, %249 : vector<8x128xf32>
    %254 = arith.addf %246, %252 : vector<8x128xf32>
    %255 = tpu.concatenate %253, %254 in 0 : vector<8x128xf32>, vector<8x128xf32> -> vector<16x128xf32>
    %256 = arith.negf %255 : vector<16x128xf32>
    %257 = math.exp %256 : vector<16x128xf32>
    %cst_81 = arith.constant 1.000000e+00 : f32
    %258 = vector.broadcast %cst_81 : f32 to vector<16x128xf32>
    %259 = arith.addf %258, %257 : vector<16x128xf32>
    %260 = arith.divf %258, %259 : vector<16x128xf32>
    %261 = math.tanh %255 : vector<16x128xf32>
    %262 = arith.select %24, %261, %260 : vector<16x128xi1>, vector<16x128xf32>
    %263 = vector.extract_strided_slice %262 {offsets = [0, 0], sizes = [16, 32], strides = [1, 1]} : vector<16x128xf32> to vector<16x32xf32>
    %264 = vector.extract_strided_slice %262 {offsets = [0, 32], sizes = [16, 32], strides = [1, 1]} : vector<16x128xf32> to vector<16x32xf32>
    %265 = vector.extract_strided_slice %262 {offsets = [0, 64], sizes = [16, 32], strides = [1, 1]} : vector<16x128xf32> to vector<16x32xf32>
    %266 = vector.extract_strided_slice %262 {offsets = [0, 96], sizes = [16, 32], strides = [1, 1]} : vector<16x128xf32> to vector<16x32xf32>
    %267 = arith.mulf %264, %234 : vector<16x32xf32>
    %268 = arith.mulf %263, %265 : vector<16x32xf32>
    %269 = arith.addf %267, %268 : vector<16x32xf32>
    %270 = math.tanh %269 : vector<16x32xf32>
    %271 = arith.mulf %266, %270 : vector<16x32xf32>
    %272 = arith.maximumf %237, %271 : vector<16x32xf32>
    %c7_i32_82 = arith.constant 7 : i32
    %c8_i32_83 = arith.constant 8 : i32
    %273 = arith.muli %c7_i32_82, %c8_i32_83 : i32
    %274 = tpu.assume_multiple %273, 8 : i32
    %c7_i32_84 = arith.constant 7 : i32
    %275 = arith.subi %c7_i32_84, %c7_i32_82 : i32
    %c8_i32_85 = arith.constant 8 : i32
    %276 = arith.muli %275, %c8_i32_85 : i32
    %277 = tpu.assume_multiple %276, 8 : i32
    %278 = arith.index_cast %274 : i32 to index
    %c0_86 = arith.constant 0 : index
    %279 = vector.load %arg13[%278, %c0_86] : memref<64x128xf32, #tpu.memory_space<vmem>>, vector<8x128xf32>
    %280 = arith.index_cast %277 : i32 to index
    %c0_87 = arith.constant 0 : index
    %281 = vector.load %arg14[%280, %c0_87] : memref<64x128xf32, #tpu.memory_space<vmem>>, vector<8x128xf32>
    %282 = vector.extract_strided_slice %271 {offsets = [0, 0], sizes = [8, 32], strides = [1, 1]} : vector<16x32xf32> to vector<8x32xf32>
    %283 = arith.truncf %282 : vector<8x32xf32> to vector<8x32xbf16>
    %cst_88 = arith.constant dense<0.000000e+00> : vector<8x128xf32>
    %284 = tpu.matmul %283, %17, %cst_88 {dimension_numbers = #tpu.dot_dimension_numbers<[1], [0], [0], [1], [0, 0, 1, 1], [], []>} : vector<8x32xbf16>, vector<32x128xbf16>, vector<8x128xf32> -> vector<8x128xf32>
    %285 = vector.extract_strided_slice %271 {offsets = [8, 0], sizes = [8, 32], strides = [1, 1]} : vector<16x32xf32> to vector<8x32xf32>
    %286 = arith.truncf %285 : vector<8x32xf32> to vector<8x32xbf16>
    %cst_89 = arith.constant dense<0.000000e+00> : vector<8x128xf32>
    %287 = tpu.matmul %286, %18, %cst_89 {dimension_numbers = #tpu.dot_dimension_numbers<[1], [0], [0], [1], [0, 0, 1, 1], [], []>} : vector<8x32xbf16>, vector<32x128xbf16>, vector<8x128xf32> -> vector<8x128xf32>
    %288 = arith.addf %279, %284 : vector<8x128xf32>
    %289 = arith.addf %281, %287 : vector<8x128xf32>
    %290 = tpu.concatenate %288, %289 in 0 : vector<8x128xf32>, vector<8x128xf32> -> vector<16x128xf32>
    %291 = arith.negf %290 : vector<16x128xf32>
    %292 = math.exp %291 : vector<16x128xf32>
    %cst_90 = arith.constant 1.000000e+00 : f32
    %293 = vector.broadcast %cst_90 : f32 to vector<16x128xf32>
    %294 = arith.addf %293, %292 : vector<16x128xf32>
    %295 = arith.divf %293, %294 : vector<16x128xf32>
    %296 = math.tanh %290 : vector<16x128xf32>
    %297 = arith.select %24, %296, %295 : vector<16x128xi1>, vector<16x128xf32>
    %298 = vector.extract_strided_slice %297 {offsets = [0, 0], sizes = [16, 32], strides = [1, 1]} : vector<16x128xf32> to vector<16x32xf32>
    %299 = vector.extract_strided_slice %297 {offsets = [0, 32], sizes = [16, 32], strides = [1, 1]} : vector<16x128xf32> to vector<16x32xf32>
    %300 = vector.extract_strided_slice %297 {offsets = [0, 64], sizes = [16, 32], strides = [1, 1]} : vector<16x128xf32> to vector<16x32xf32>
    %301 = vector.extract_strided_slice %297 {offsets = [0, 96], sizes = [16, 32], strides = [1, 1]} : vector<16x128xf32> to vector<16x32xf32>
    %302 = arith.mulf %299, %269 : vector<16x32xf32>
    %303 = arith.mulf %298, %300 : vector<16x32xf32>
    %304 = arith.addf %302, %303 : vector<16x32xf32>
    %305 = math.tanh %304 : vector<16x32xf32>
    %306 = arith.mulf %301, %305 : vector<16x32xf32>
    %307 = arith.maximumf %272, %306 : vector<16x32xf32>
    %c8_i32_91 = arith.constant 8 : i32
    %c0_92 = arith.constant 0 : index
    %c0_93 = arith.constant 0 : index
    %308 = vector.load %arg10[%c0_92, %c0_93] : memref<16x32xf32, #tpu.memory_space<vmem>>, vector<16x32xf32>
    tpu.vector_store %arg10[%c0_92, %c0_93], %306 {strides = array<i32>} : memref<16x32xf32, #tpu.memory_space<vmem>>, vector<16x32xf32>,
    %c0_94 = arith.constant 0 : index
    %c0_95 = arith.constant 0 : index
    %309 = vector.load %arg11[%c0_94, %c0_95] : memref<16x32xf32, #tpu.memory_space<vmem>>, vector<16x32xf32>
    tpu.vector_store %arg11[%c0_94, %c0_95], %304 {strides = array<i32>} : memref<16x32xf32, #tpu.memory_space<vmem>>, vector<16x32xf32>,
    %c0_96 = arith.constant 0 : index
    %c0_97 = arith.constant 0 : index
    %310 = vector.load %arg12[%c0_96, %c0_97] : memref<16x32xf32, #tpu.memory_space<vmem>>, vector<16x32xf32>
    tpu.vector_store %arg12[%c0_96, %c0_97], %307 {strides = array<i32>} : memref<16x32xf32, #tpu.memory_space<vmem>>, vector<16x32xf32>,
    %c0_i32_98 = arith.constant 0 : i32
    %311 = arith.cmpi eq, %arg0, %c0_i32_98 : i32
    %312 = arith.extui %311 : i1 to i32
    %c0_i32_99 = arith.constant 0 : i32
    %313 = arith.cmpi ne, %312, %c0_i32_99 : i32
    scf.if %313 {
      %314 = vector.extract_strided_slice %307 {offsets = [0, 0], sizes = [8, 32], strides = [1, 1]} : vector<16x32xf32> to vector<8x32xf32>
      %315 = vector.extract_strided_slice %307 {offsets = [8, 0], sizes = [8, 32], strides = [1, 1]} : vector<16x32xf32> to vector<8x32xf32>
      %316 = tpu.concatenate %314, %315 in 1 : vector<8x32xf32>, vector<8x32xf32> -> vector<8x64xf32>
      %c0_100 = arith.constant 0 : index
      %c0_101 = arith.constant 0 : index
      %317 = vector.load %arg9[%c0_100, %c0_101] : memref<8x64xf32, #tpu.memory_space<vmem>>, vector<8x64xf32>
      tpu.vector_store %arg9[%c0_100, %c0_101], %316 {strides = array<i32>} : memref<8x64xf32, #tpu.memory_space<vmem>>, vector<8x64xf32>,
    } else {
    }
    return
  }
  func.func @transform_0(%arg0: i32) -> (i32, i32) {
    %c0_i32 = arith.constant 0 : i32
    %c0_i32_0 = arith.constant 0 : i32
    return %arg0, %c0_i32 : i32, i32
  }
  func.func @transform_1(%arg0: i32) -> (i32, i32) {
    %c0_i32 = arith.constant 0 : i32
    %0 = arith.subi %c0_i32, %arg0 : i32
    %c0_i32_0 = arith.constant 0 : i32
    %c0_i32_1 = arith.constant 0 : i32
    return %0, %c0_i32_0 : i32, i32
  }
  func.func @transform_2(%arg0: i32) -> (i32, i32) {
    %c0_i32 = arith.constant 0 : i32
    %c0_i32_0 = arith.constant 0 : i32
    %c0_i32_1 = arith.constant 0 : i32
    return %c0_i32, %c0_i32_0 : i32, i32
  }
  func.func @transform_3(%arg0: i32) -> (i32, i32) {
    %c0_i32 = arith.constant 0 : i32
    %c0_i32_0 = arith.constant 0 : i32
    %c0_i32_1 = arith.constant 0 : i32
    return %c0_i32, %c0_i32_0 : i32, i32
  }
  func.func @transform_4(%arg0: i32) -> (i32, i32) {
    %c0_i32 = arith.constant 0 : i32
    %c0_i32_0 = arith.constant 0 : i32
    %c0_i32_1 = arith.constant 0 : i32
    return %c0_i32, %c0_i32_0 : i32, i32
  }
  func.func @transform_5(%arg0: i32) -> (i32, i32) {
    %c0_i32 = arith.constant 0 : i32
    %c0_i32_0 = arith.constant 0 : i32
    %c0_i32_1 = arith.constant 0 : i32
    return %c0_i32, %c0_i32_0 : i32, i32
  }
  func.func @transform_6(%arg0: i32) -> (i32, i32) {
    %c0_i32 = arith.constant 0 : i32
    %c0_i32_0 = arith.constant 0 : i32
    %c0_i32_1 = arith.constant 0 : i32
    return %c0_i32, %c0_i32_0 : i32, i32
  }
  func.func @transform_7(%arg0: i32) -> (i32, i32) {
    %c0_i32 = arith.constant 0 : i32
    %c0_i32_0 = arith.constant 0 : i32
    %c0_i32_1 = arith.constant 0 : i32
    return %c0_i32, %c0_i32_0 : i32, i32
  }
  func.func @transform_8(%arg0: i32) -> (i32, i32) {
    %c0_i32 = arith.constant 0 : i32
    %c0_i32_0 = arith.constant 0 : i32
    %c0_i32_1 = arith.constant 0 : i32
    return %c0_i32, %c0_i32_0 : i32, i32
  }
}

</mosaic_0001>

<bundles_post_ra>
// kernel: tpu_custom_call.1
= control target key start
LH: loop header
LB: loop body
LE: loop exit
PB: predicated region body
PF: predicated region fallthrough
CT: control target
= control target key end

     0   :  { %13 = vsyncpa [#allocation8], 0  ;;  %s3042_s0 = inlined_call_operand.hbm [shape: bf16[64,128], index: 0, kind: input, shape index: {}]   ;;  %s3043_s1 = inlined_call_operand.hbm [shape: bf16[64,128], index: 1, kind: input, shape index: {}]   ;;  %s3044_s2 = inlined_call_operand.hbm [shape: bf16[128,128], index: 2, kind: input, shape index: {}]   ;;  %s3045_s3 = inlined_call_operand.hbm [shape: bf16[128,128], index: 3, kind: input, shape index: {}]   ;;  %s3046_s4 = inlined_call_operand.hbm [shape: bf16[32,128], index: 4, kind: input, shape index: {}]   ;;  %s3047_s5 = inlined_call_operand.vmem [shape: bf16[32,128], index: 5, kind: input, shape index: {}]   ;;  %s3048_s6 = inlined_call_operand.vmem [shape: f32[1,128], index: 6, kind: input, shape index: {}]   ;;  %s3049_s7 = inlined_call_operand.vmem [shape: f32[1,128], index: 7, kind: input, shape index: {}]   ;;  %s3050_s8 = inlined_call_operand.hbm [shape: f32[8,64], index: 8, kind: output, shape index: {}]  }
   0x1   :  { %14 = vsyncpa [#allocation11], 0 }
   0x2   :  { %15 = vsyncpa [#allocation14], 0 }
   0x3   :  { %16 = vsyncpa [#allocation9], 0  ;;  %s2454_s27 = smov [#allocation10]   ;;  %s2455_s29 = smov [#allocation13]  }
   0x4   :  { %s38_s28 = sshll.u32 %s2454_s27, 4  ;;  %s62_s30 = sshll.u32 %s2455_s29, 4  ;;  %s39_s28 = int_to_ptr.vmem [resolvable:$true] %s38_s28  ;;  %s2512_s30 = int_to_ptr.vmem [resolvable:$true] %s62_s30 }
   0x5   :  { %s2314_s11 = scalar_lea.hbm %s3043_s1, 512 }
   0x6   :  { %p2315_p0 = scmp.ne.s32.totalorder %s3043_s1, %s2314_s11  ;;  %p2318_p1 = scmp.lt.u32.totalorder %s2314_s11, %s3043_s1 }
   0x8   :  { %p2320_p2 = pnand %p2318_p1, %p2315_p0 }
   0xa   :  { %2323 = shalt.err (!%p2320_p2)
}
   0xb   :  { %s2324_s16 = scalar_lea.vmem %s39_s28, 512  ;;  %p2329_p4 = scmp.lt.s32.totalorder %s39_s28, %s39_s28 }
   0xc   :  { %p2325_p3 = scmp.ne.s32.totalorder %s39_s28, %s2324_s16  ;;  %p2330_p5 = scmp.lt.s32.totalorder %s2324_s16, %s2324_s16 }
   0xe   :  { %p2331_p6 = por %p2330_p5, %p2329_p4 }
  0x10   :  { %p2332_p7 = pnand %p2331_p6, %p2325_p3 }
  0x12   :  { %2335 = shalt.err (!%p2332_p7)
}
  0x13   :  { %s2456_s17 = smov 64   ;;  %s2457_s18 = smov 4  }
  0x14   :  { %44 = dma.hbm_to_vmem [thread:$0]  %s3043_s1, 512, %s39_s28, [#allocation11], %s2456_s17, %s2456_s17, %s2457_s18  }
  0x15   :  { %s2336_s23 = scalar_lea.hbm %s3045_s3, 1024 }
  0x16   :  { %p2337_p8 = scmp.ne.s32.totalorder %s3045_s3, %s2336_s23  ;;  %p2340_p9 = scmp.lt.u32.totalorder %s2336_s23, %s3045_s3 }
  0x18   :  { %p2342_p10 = pnand %p2340_p9, %p2337_p8 }
  0x1a   :  { %2345 = shalt.err (!%p2342_p10)
}
  0x1b   :  { %s2346_s29 = scalar_lea.vmem %s2512_s30, 1024  ;;  %p2351_p12 = scmp.lt.s32.totalorder %s2512_s30, %s2512_s30 }
  0x1c   :  { %p2347_p11 = scmp.ne.s32.totalorder %s2512_s30, %s2346_s29  ;;  %p2352_p13 = scmp.lt.s32.totalorder %s2346_s29, %s2346_s29 }
  0x1e   :  { %p2353_p0 = por %p2352_p13, %p2351_p12 }
  0x20   :  { %p2354_p1 = pnand %p2353_p0, %p2347_p11 }
  0x22   :  { %2357 = shalt.err (!%p2354_p1)
}
  0x23   :  { %68 = dma.hbm_to_vmem [thread:$0]  %s3045_s3, 1024, %s2512_s30, [#allocation14], %s2456_s17, %s2456_s17, %s2457_s18  }
  0x24   :  { %s2458_s9 = smov [#allocation7]   ;;  %s2459_s11 = smov [#allocation12]  }
  0x25   :  { %s22_s10 = sshll.u32 %s2458_s9, 4  ;;  %s50_s12 = sshll.u32 %s2459_s11, 4  ;;  %s23_s10 = int_to_ptr.vmem [resolvable:$true] %s22_s10  ;;  %s2549_s12 = int_to_ptr.vmem [resolvable:$true] %s50_s12 }
  0x26   :  { %s2358_s15 = scalar_lea.hbm %s3042_s0, 512 }
  0x27   :  { %p2359_p2 = scmp.ne.s32.totalorder %s3042_s0, %s2358_s15  ;;  %p2362_p3 = scmp.lt.u32.totalorder %s2358_s15, %s3042_s0 }
  0x29   :  { %p2364_p4 = pnand %p2362_p3, %p2359_p2 }
  0x2b   :  { %2367 = shalt.err (!%p2364_p4)
}
  0x2c   :  { %s2368_s3 = scalar_lea.vmem %s23_s10, 512  ;;  %p2373_p6 = scmp.lt.s32.totalorder %s23_s10, %s23_s10 }
  0x2d   :  { %p2369_p5 = scmp.ne.s32.totalorder %s23_s10, %s2368_s3  ;;  %p2374_p7 = scmp.lt.s32.totalorder %s2368_s3, %s2368_s3 }
  0x2f   :  { %p2375_p8 = por %p2374_p7, %p2373_p6 }
  0x31   :  { %p2376_p9 = pnand %p2375_p8, %p2369_p5 }
  0x33   :  { %2379 = shalt.err (!%p2376_p9)
}
  0x34   :  { %28 = dma.hbm_to_vmem [thread:$0]  %s3042_s0, 512, %s23_s10, [#allocation8], %s2456_s17, %s2456_s17, %s2457_s18  }
  0x35   :  { %s2380_s25 = scalar_lea.hbm %s3044_s2, 1024 }
  0x36   :  { %p2381_p10 = scmp.ne.s32.totalorder %s3044_s2, %s2380_s25  ;;  %p2384_p11 = scmp.lt.u32.totalorder %s2380_s25, %s3044_s2 }
  0x38   :  { %p2386_p12 = pnand %p2384_p11, %p2381_p10 }
  0x3a   :  { %2389 = shalt.err (!%p2386_p12)
}
  0x3b   :  { %s2390_s28 = scalar_lea.vmem %s2549_s12, 1024  ;;  %p2395_p0 = scmp.lt.s32.totalorder %s2549_s12, %s2549_s12 }
  0x3c   :  { %p2391_p13 = scmp.ne.s32.totalorder %s2549_s12, %s2390_s28  ;;  %p2396_p1 = scmp.lt.s32.totalorder %s2390_s28, %s2390_s28 }
  0x3e   :  { %p2397_p2 = por %p2396_p1, %p2395_p0 }
  0x40   :  { %p2398_p3 = pnand %p2397_p2, %p2391_p13 }
  0x42   :  { %2401 = shalt.err (!%p2398_p3)
}
  0x43   :  { %56 = dma.hbm_to_vmem [thread:$0]  %s3044_s2, 1024, %s2549_s12, [#allocation11], %s2456_s17, %s2456_s17, %s2457_s18  }
  0x44   :  { %s2460_s10 = smov [#allocation15]   ;;  %s2402_s15 = scalar_lea.hbm %s3046_s4, 256 }
  0x45   :  { %s74_s11 = sshll.u32 %s2460_s10, 4  ;;  %p2403_p4 = scmp.ne.s32.totalorder %s3046_s4, %s2402_s15  ;;  %s75_s11 = int_to_ptr.vmem [resolvable:$true] %s74_s11 }
  0x46   :  { %p2406_p5 = scmp.lt.u32.totalorder %s2402_s15, %s3046_s4 }
  0x48   :  { %p2408_p6 = pnand %p2406_p5, %p2403_p4 }
  0x4a   :  { %2411 = shalt.err (!%p2408_p6)
}
  0x4b   :  { %s2412_s3 = scalar_lea.vmem %s75_s11, 256  ;;  %p2417_p8 = scmp.lt.s32.totalorder %s75_s11, %s75_s11 }
  0x4c   :  { %p2413_p7 = scmp.ne.s32.totalorder %s75_s11, %s2412_s3  ;;  %p2418_p9 = scmp.lt.s32.totalorder %s2412_s3, %s2412_s3 }
  0x4e   :  { %p2419_p10 = por %p2418_p9, %p2417_p8 }
  0x50   :  { %p2420_p11 = pnand %p2419_p10, %p2413_p7 }
  0x52   :  { %2423 = shalt.err (!%p2420_p11)
}
  0x53   :  { %80 = dma.hbm_to_vmem [thread:$0]  %s3046_s4, 256, %s75_s11, [#allocation14], %s2456_s17, %s2456_s17, %s2457_s18  }
  0x54   :  { %2446 = dma.done.wait [#allocation8], 512  }
  0x55   :  { %2447 = vsyncadd [#allocation8], 4294966784 }
  0x56   :  { %2448 = dma.done.wait [#allocation11], 1536  }
  0x57   :  { %2449 = vsyncadd [#allocation11], 4294965760 }
  0x58   :  { %2450 = dma.done.wait [#allocation14], 1280  }
  0x59   :  { %2451 = vsyncadd [#allocation14], 4294966016  ;;  %vm109_vm0 = vcmask 261120   ;;  %v2461_v0 = vmov 0.0   ;;  %v2158_v1 = vld [vmem:[#allocation12] sm:$0xff]   ;;  %v2160_v3 = vld [vmem:[#allocation12 + $0x8] sm:$0xff]  }
  0x5a   :  { %110 = vst.msk [vmem:[#allocation2] sm:$0xff] %vm109_vm0, %v2461_v0  ;;  %111 = vst.msk [vmem:[#allocation2 + $0x8] sm:$0xff] %vm109_vm0, %v2461_v0  ;;  %v2159_v2 = vld [vmem:[#allocation13] sm:$0xff]   ;;  %1969 = vmatprep.subr.bf16.mxu0 %v2158_v1  ;;  %v2161_v4 = vld [vmem:[#allocation13 + $0x8] sm:$0xff]   ;;  %vm2462_vm1 = vmmov 0   ;;  %vm1814_vm5 = vcmask 523264  }
  0x5b   :  { %112 = vst.msk [vmem:[#allocation3] sm:$0xff] %vm109_vm0, %v2461_v0  ;;  %113 = vst.msk [vmem:[#allocation3 + $0x8] sm:$0xff] %vm109_vm0, %v2461_v0  ;;  %1993 = vmatprep.subr.bf16.mxu1 %v2159_v2  ;;  %1970 = vmatpush3.bf16.msra.mxu0 %v2158_v1  ;;  %v2162_v5 = vld [vmem:[#allocation12 + $0x10] sm:$0xff]   ;;  %v2164_v7 = vld [vmem:[#allocation12 + $0x18] sm:$0xff]  }
  0x5c   :  { %1994 = vmatpush3.bf16.msra.mxu1 %v2159_v2  ;;  %1971 = vmatprep.subr.bf16.mxu0 %v2160_v3  ;;  %v2163_v6 = vld [vmem:[#allocation13 + $0x10] sm:$0xff]   ;;  %v2165_v8 = vld [vmem:[#allocation13 + $0x18] sm:$0xff]   ;;  %v2166_v9 = vld [vmem:[#allocation12 + $0x20] sm:$0xff]  }
  0x5d   :  { %1995 = vmatprep.subr.bf16.mxu1 %v2161_v4  ;;  %v2167_v10 = vld [vmem:[#allocation13 + $0x20] sm:$0xff]   ;;  %v2168_v11 = vld [vmem:[#allocation12 + $0x28] sm:$0xff]   ;;  %v2170_v15 = vld [vmem:[#allocation12 + $0x30] sm:$0xff]  }
  0x5e   :  { %v2169_v12 = vld [vmem:[#allocation13 + $0x28] sm:$0xff]   ;;  %v2174_v13 = vld [vmem:[#allocation7] sm:$0xff]   ;;  %v2171_v16 = vld [vmem:[#allocation13 + $0x30] sm:$0xff]  }
  0x5f   :  { %1972 = vmatpush3.bf16.msra.mxu0 %v2160_v3  ;;  %v2175_v14 = vld [vmem:[#allocation10] sm:$0xff]   ;;  %1985 = vmatprep.mubr.bf16.mxu0 %v2174_v13  ;;  %v2172_v17 = vld [vmem:[#allocation12 + $0x38] sm:$0xff]   ;;  %v2176_v19 = vld [vmem:[#allocation7 + $0x8] sm:$0xff]  }
  0x60   :  { %1996 = vmatpush3.bf16.msra.mxu1 %v2161_v4  ;;  %1973 = vmatprep.subr.bf16.mxu0 %v2162_v5  ;;  %v2173_v18 = vld [vmem:[#allocation13 + $0x38] sm:$0xff]   ;;  %v2177_v20 = vld [vmem:[#allocation10 + $0x8] sm:$0xff]   ;;  %v2179_v21 = vld [vmem:[#allocation7 + $0x10] sm:$0xff]  }
  0x61   :  { %1997 = vmatprep.subr.bf16.mxu1 %v2163_v6  ;;  %2009 = vmatprep.mubr.bf16.mxu1 %v2175_v14  ;;  %v2612_v22 = vld [vmem:[%s3047_s5] sm:$0xff]   ;;  %v2616_v24 = vld [vmem:[#allocation15] sm:$0xff]   ;;  %v2622_v25 = vld [vmem:[%s3047_s5 + $0x8] sm:$0xff]  }
  0x62   :  { %v2180_v23 = vld [vmem:[#allocation10 + $0x10] sm:$0xff]   ;;  %v2626_v26 = vld [vmem:[#allocation15 + $0x8] sm:$0xff]   ;;  %v2181_v27 = vld [vmem:[#allocation7 + $0x18] sm:$0xff]  }
  0x63   :  { %1974 = vmatpush3.bf16.msra.mxu0 %v2162_v5  ;;  %v2182_v28 = vld [vmem:[#allocation10 + $0x18] sm:$0xff]   ;;  %v481_v29 = vld [vmem:[#allocation2] sm:$0xff] }
  0x64   :  { %1998 = vmatpush3.bf16.msra.mxu1 %v2163_v6  ;;  %1975 = vmatprep.subr.bf16.mxu0 %v2164_v7  ;;  %v482_v30 = vld [vmem:[#allocation2 + $0x8] sm:$0xff]  ;;  %v490_v31 = vpack.c.bf16 %v481_v29, %v481_v29  ;;  %v1848_v33 = vld [vmem:[%s3049_s7] ss:$0 sm:$0xff]  ;;  %s2465_s7 = smov 96  }
  0x65   :  { %1999 = vmatprep.subr.bf16.mxu1 %v2165_v8  ;;  %v547_v32 = vpack.c.bf16 %v482_v30, %v482_v30  ;;  %v1835_v35 = vld [vmem:[%s3048_s6] ss:$0 sm:$0xff]  ;;  %s2463_s6 = smov 32  }
  0x67   :  { %1976 = vmatpush3.bf16.msra.mxu0 %v2164_v7 }
  0x68   :  { %2000 = vmatpush3.bf16.msra.mxu1 %v2165_v8  ;;  %1977 = vmatprep.subr.bf16.mxu0 %v2166_v9 }
  0x69   :  { %2001 = vmatprep.subr.bf16.mxu1 %v2167_v10 }
  0x6b   :  { %1978 = vmatpush3.bf16.msra.mxu0 %v2166_v9 }
  0x6c   :  { %2002 = vmatpush3.bf16.msra.mxu1 %v2167_v10  ;;  %1979 = vmatprep.subr.bf16.mxu0 %v2168_v11 }
  0x6d   :  { %2003 = vmatprep.subr.bf16.mxu1 %v2169_v12 }
  0x6f   :  { %1980 = vmatpush3.bf16.msra.mxu0 %v2168_v11 }
  0x70   :  { %2004 = vmatpush3.bf16.msra.mxu1 %v2169_v12  ;;  %1981 = vmatprep.subr.bf16.mxu0 %v2170_v15 }
  0x71   :  { %2005 = vmatprep.subr.bf16.mxu1 %v2171_v16 }
  0x73   :  { %1982 = vmatpush3.bf16.msra.mxu0 %v2170_v15 }
  0x74   :  { %2006 = vmatpush3.bf16.msra.mxu1 %v2171_v16  ;;  %1983 = vmatprep.subr.bf16.mxu0 %v2172_v17 }
  0x75   :  { %2007 = vmatprep.subr.bf16.mxu1 %v2173_v18 }
  0x77   :  { %1984 = vmatpush3.bf16.msra.mxu0 %v2172_v17  ;;  %v476_v17 = vlaneseq }
  0x78   :  { %2008 = vmatpush3.bf16.msra.mxu1 %v2173_v18  ;;  %2017 = vmatprep.subr.bf16.mxu0 %v2461_v0 }
  0x79   :  { %2025 = vmatprep.subr.bf16.mxu1 %v2461_v0 }
  0x7a   :  { %1986 = vmatmul.mubr.bf16.vlgmr.msra.gmra.mrb[0].mxu0 %v2176_v19 }
  0x7b   :  { %2010 = vmatmul.mubr.bf16.vlgmr.msra.gmra.mrb[0].mxu1 %v2177_v20  ;;  %1989 = vmatprep.mubr.bf16.mxu0 %v2179_v21  ;;  %v477_v21 = vand.u32 127, %v476_v17 }
  0x7c   :  { %2026 = vmatpush3.bf16.msra.mxu1 %v2612_v22  ;;  %2013 = vmatprep.mubr.bf16.mxu1 %v2180_v23 }
  0x7d   :  { %2027 = vmatprep.subr.bf16.mxu1 %v2461_v0  ;;  %2018 = vmatpush3.bf16.msra.mxu0 %v2616_v24  ;;  %vm478_vm2 = vcmp.ge.s32.totalorder %v477_v21, 64  ;;  %vm479_vm3 = vcmp.lt.s32.totalorder %v477_v21, 96 }
  0x7e   :  { %2019 = vmatprep.subr.bf16.mxu0 %v2461_v0  ;;  %vm2685_vm4 = vmand %vm478_vm2, %vm479_vm3 }
  0x80   :  { %2028 = vmatpush3.bf16.msra.mxu1 %v2622_v25 }
  0x81   :  { %2020 = vmatpush3.bf16.msra.mxu0 %v2626_v26  ;;  %2041 = vmatprep.subr.bf16.mxu1 %v2461_v0 }
  0x82   :  { %1990 = vmatmul.mubr.bf16.gmra.mrb[4].mxu0 %v2181_v27  ;;  %2033 = vmatprep.subr.bf16.mxu0 %v2461_v0 }
  0x83   :  { %2014 = vmatmul.mubr.bf16.gmra.mrb[4].mxu1 %v2182_v28  ;;  %2021 = vmatprep.mubr.msk.bf16.mxu0 %vm2462_vm1, %v2461_v0 }
  0x84   :  { %2029 = vmatprep.mubr.msk.bf16.mxu1 %vm2462_vm1, %v2461_v0 }
  0x8a   :  { %2022 = vmatmul.mubr.msk.bf16.vlgmr.msra.gmra.mrb[8].mxu0 %vm109_vm0, %v490_v31 }
  0x8b   :  { %2030 = vmatmul.mubr.msk.bf16.vlgmr.msra.gmra.mrb[8].mxu1 %vm109_vm0, %v547_v32  ;;  %2034 = vmatpush3.bf16.msra.mxu0 %v2616_v24 }
  0x8c   :  { %2042 = vmatpush3.bf16.msra.mxu1 %v2612_v22  ;;  %2045 = vmatprep.mubr.msk.bf16.mxu1 %vm2462_vm1, %v2461_v0 }
  0x8d   :  { %2043 = vmatprep.subr.bf16.mxu1 %v2461_v0  ;;  %2035 = vmatprep.subr.bf16.mxu0 %v2461_v0 }
  0x8e   :  { %2037 = vmatprep.mubr.msk.bf16.mxu0 %vm2462_vm1, %v2461_v0 }
  0x8f   :  { %2036 = vmatpush3.bf16.msra.mxu0 %v2626_v26 }
  0x90   :  { %2044 = vmatpush3.bf16.msra.mxu1 %v2622_v25  ;;  %2049 = vmatprep.subr.bf16.mxu0 %v2461_v0 }
  0x91   :  { %2057 = vmatprep.subr.bf16.mxu1 %v2461_v0 }
 0x14d   :  { %v1987_v34 = vpop.f32.mrb[0].mxu0 }
 0x14e   :  { %v2011_v36 = vpop.f32.mrb[0].mxu1  ;;  %v2657_v37 = vadd.f32 %v1987_v34, %v1835_v35  ;;  %v253_v38 = vpop.f32.mrb[1].mxu0  ;;  %v483_v34 = vld [vmem:[#allocation3] sm:$0xff] }
 0x14f   :  { %v2659_v39 = vadd.f32 %v2011_v36, %v1848_v33  ;;  %v429_v40 = vpop.f32.mrb[1].mxu1  ;;  %v1988_v41 = vpop.f32.mrb[2].mxu0  ;;  %v254_v1 = vadd.f32 %v1835_v35, %v253_v38 }
 0x150   :  { %v2661_v42 = vadd.f32 %v1848_v33, %v429_v40  ;;  %v2012_v43 = vpop.f32.mrb[2].mxu1  ;;  %v2663_v44 = vadd.f32 %v1988_v41, %v1835_v35  ;;  %v256_v45 = vpop.f32.mrb[3].mxu0 }
 0x151   :  { %v2665_v46 = vadd.f32 %v2012_v43, %v1848_v33  ;;  %v432_v47 = vpop.f32.mrb[3].mxu1  ;;  %v2667_v48 = vadd.f32 %v1835_v35, %v256_v45 }
 0x152   :  { %v2669_v49 = vadd.f32 %v1848_v33, %v432_v47 }
 0x155   :  { %v1991_v50 = vpop.f32.mrb[4].mxu0 }
 0x156   :  { %v2015_v51 = vpop.f32.mrb[4].mxu1  ;;  %v2671_v52 = vadd.f32 %v1991_v50, %v1835_v35  ;;  %v269_v53 = vpop.f32.mrb[5].mxu0 }
 0x157   :  { %v2673_v54 = vadd.f32 %v2015_v51, %v1848_v33  ;;  %v445_v55 = vpop.f32.mrb[5].mxu1  ;;  %v2675_v56 = vadd.f32 %v1835_v35, %v269_v53  ;;  %v1992_v57 = vpop.f32.mrb[6].mxu0 }
 0x158   :  { %v2677_v58 = vadd.f32 %v1848_v33, %v445_v55  ;;  %v2016_v59 = vpop.f32.mrb[6].mxu1  ;;  %v2679_v60 = vadd.f32 %v1992_v57, %v1835_v35  ;;  %v272_v61 = vpop.f32.mrb[7].mxu0 }
 0x159   :  { %v448_v62 = vpop.f32.mrb[7].mxu1  ;;  %v2681_v63 = vadd.f32 %v1835_v35, %v272_v61  ;;  %v457_v3 = vadd.f32 %v2016_v59, %v1848_v33 }
 0x15a   :  { %v2683_v2 = vadd.f32 %v1848_v33, %v448_v62  ;;  %v484_v33 = vld [vmem:[#allocation3 + $0x8] sm:$0xff] }
 0x15d   :  { %v541_v4 = vpop.f32.mrb[8].mxu0 }
 0x15e   :  { %v603_v5 = vadd.f32 %v541_v4, %v254_v1  ;;  %v597_v6 = vpop.f32.mrb[8].mxu1  ;;  %v2023_v7 = vpop.f32.mrb[9].mxu0 }
 0x15f   :  { %v604_v8 = vadd.f32 %v597_v6, %v457_v3  ;;  %v2031_v9 = vpop.f32.mrb[9].mxu1  ;;  %v544_v10 = vpop.f32.mrb[10].mxu0 }
 0x160   :  { %v1867_v11 = vmul.f32 -1.442695, %v603_v5  ;;  %v600_v12 = vpop.f32.mrb[10].mxu1  ;;  %v2024_v13 = vpop.f32.mrb[11].mxu0 }
 0x161   :  { %v1868_v14 = vmul.f32 -1.442695, %v604_v8  ;;  %v2032_v15 = vpop.f32.mrb[11].mxu1 }
 0x162   :  { %2186 = vpow2.f32 %v1867_v11 }
 0x163   :  { %2188 = vpow2.f32 %v1868_v14 }
 0x164   :  { %2190 = vtanh.f32 %v603_v5 }
 0x165   :  { %2192 = vtanh.f32 %v604_v8 }
 0x16c   :  { %v2187_v16 = vpop.eup %2186 }
 0x16d   :  { %v2189_v18 = vpop.eup %2188  ;;  %v611_v19 = vadd.f32 1.0, %v2187_v16 }
 0x16e   :  { %v612_v20 = vadd.f32 1.0, %v2189_v18  ;;  %v2191_v23 = vpop.eup %2190 }
 0x16f   :  { %2194 = vrcp.f32 %v611_v19  ;;  %v2193_v28 = vpop.eup %2192 }
 0x170   :  { %2196 = vrcp.f32 %v612_v20 }
 0x179   :  { %v2195_v29 = vpop.eup %2194 }
 0x17a   :  { %v2197_v30 = vpop.eup %2196  ;;  %v619_v31 = vsel %vm2685_vm4, %v2191_v23, %v2195_v29 }
 0x17b   :  { %v620_v32 = vsel %vm2685_vm4, %v2193_v28, %v2197_v30  ;;  %633 = vrot.lane.b32.xlu1 %v619_v31, %s2456_s17 }
 0x17c   :  { %635 = vrot.lane.b32.xlu0 %v620_v32, %s2456_s17 }
 0x180   :  { %625 = vrot.lane.b32.xlu0 %v484_v33, %s2463_s6 }
 0x184   :  { %623 = vrot.lane.b32.xlu0 %v483_v34, %s2463_s6 }
 0x1ed   :  { %v634_v38 = vpop.permute.xlu1 %633 }
 0x1ee   :  { %v636_v35 = vpop.permute.xlu0 %635  ;;  %v639_v40 = vmul.f32 %v634_v38, %v619_v31 }
 0x1ef   :  { %v640_v36 = vmul.f32 %v636_v35, %v620_v32 }
 0x1f1   :  { %645 = vrot.lane.b32.xlu1 %v640_v36, %s2463_s6 }
 0x1f2   :  { %v626_v41 = vpop.permute.xlu0 %625 }
 0x1f3   :  { %v630_v43 = vmul.f32 %v626_v41, %v620_v32 }
 0x1f5   :  { %643 = vrot.lane.b32.xlu1 %v639_v40, %s2463_s6 }
 0x1f6   :  { %v624_v45 = vpop.permute.xlu0 %623 }
 0x1f7   :  { %v629_v51 = vmul.f32 %v624_v45, %v619_v31 }
 0x263   :  { %v646_v47 = vpop.permute.xlu1 %645 }
 0x264   :  { %v2699_v50 = vadd.f32 %v646_v47, %v630_v43 }
 0x266   :  { %2198 = vtanh.f32 %v2699_v50 }
 0x267   :  { %v644_v53 = vpop.permute.xlu1 %643 }
 0x268   :  { %v2702_v55 = vadd.f32 %v644_v53, %v629_v51 }
 0x26a   :  { %2200 = vtanh.f32 %v2702_v55 }
 0x270   :  { %v2199_v57 = vpop.eup %2198 }
 0x271   :  { %657 = vrot.lane.b32.xlu0 %v2199_v57, %s2456_s17 }
 0x274   :  { %v2201_v59 = vpop.eup %2200 }
 0x275   :  { %655 = vrot.lane.b32.xlu1 %v2201_v59, %s2456_s17 }
 0x2e3   :  { %v658_v61 = vpop.permute.xlu0 %657 }
 0x2e4   :  { %v2707_v62 = vmul.f32 %v658_v61, %v620_v32 }
 0x2e6   :  { %v724_v1 = vpack.c.bf16 %v2707_v62, %v2707_v62 }
 0x2e7   :  { %v656_v3 = vpop.permute.xlu1 %655 }
 0x2e8   :  { %v2711_v4 = vmul.f32 %v656_v3, %v619_v31  ;;  %726 = vrot.lane.b32.xlu0 %v724_v1, %s2463_s6 }
 0x2ea   :  { %v677_v5 = vpack.c.bf16 %v2711_v4, %v2711_v4 }
 0x2ec   :  { %679 = vrot.lane.b32.xlu1 %v677_v5, %s2463_s6 }
 0x35a   :  { %v727_v6 = vpop.permute.xlu0 %726 }
 0x35b   :  { %2046 = vmatmul.mubr.msk.bf16.vlgmr.msra.gmra.mrb[12].mxu1 %vm109_vm0, %v727_v6 }
 0x35c   :  { %2058 = vmatpush3.bf16.msra.mxu1 %v2612_v22  ;;  %2061 = vmatprep.mubr.msk.bf16.mxu1 %vm2462_vm1, %v2461_v0 }
 0x35d   :  { %2059 = vmatprep.subr.bf16.mxu1 %v2461_v0 }
 0x35e   :  { %v680_v7 = vpop.permute.xlu1 %679 }
 0x35f   :  { %2038 = vmatmul.mubr.msk.bf16.vlgmr.msra.gmra.mrb[12].mxu0 %vm109_vm0, %v680_v7 }
 0x360   :  { %2050 = vmatpush3.bf16.msra.mxu0 %v2616_v24  ;;  %2060 = vmatpush3.bf16.msra.mxu1 %v2622_v25 }
 0x361   :  { %2051 = vmatprep.subr.bf16.mxu0 %v2461_v0  ;;  %2053 = vmatprep.mubr.msk.bf16.mxu0 %vm2462_vm1, %v2461_v0 }
 0x362   :  { %2073 = vmatprep.subr.bf16.mxu1 %v2461_v0 }
 0x364   :  { %2052 = vmatpush3.bf16.msra.mxu0 %v2626_v26 }
 0x365   :  { %2065 = vmatprep.subr.bf16.mxu0 %v2461_v0 }
 0x42e   :  { %v765_v8 = vpop.f32.mrb[12].mxu1 }
 0x42f   :  { %v772_v9 = vadd.f32 %v765_v8, %v2673_v54  ;;  %v2047_v10 = vpop.f32.mrb[13].mxu1 }
 0x430   :  { %v768_v11 = vpop.f32.mrb[14].mxu1 }
 0x431   :  { %v1872_v12 = vmul.f32 -1.442695, %v772_v9  ;;  %v2048_v13 = vpop.f32.mrb[15].mxu1 }
 0x432   :  { %v718_v14 = vpop.f32.mrb[12].mxu0 }
 0x433   :  { %2202 = vpow2.f32 %v1872_v12  ;;  %v771_v15 = vadd.f32 %v718_v14, %v2667_v48  ;;  %v2039_v16 = vpop.f32.mrb[13].mxu0 }
 0x434   :  { %v721_v17 = vpop.f32.mrb[14].mxu0 }
 0x435   :  { %v1871_v18 = vmul.f32 -1.442695, %v771_v15  ;;  %v2040_v19 = vpop.f32.mrb[15].mxu0 }
 0x437   :  { %2204 = vpow2.f32 %v1871_v18 }
 0x438   :  { %2206 = vtanh.f32 %v772_v9 }
 0x43d   :  { %v2203_v20 = vpop.eup %2202 }
 0x43e   :  { %v780_v21 = vadd.f32 1.0, %v2203_v20 }
 0x440   :  { %2208 = vrcp.f32 %v780_v21 }
 0x441   :  { %v2205_v23 = vpop.eup %2204  ;;  %2210 = vtanh.f32 %v771_v15 }
 0x442   :  { %v779_v28 = vadd.f32 1.0, %v2205_v23  ;;  %v2207_v54 = vpop.eup %2206 }
 0x444   :  { %2212 = vrcp.f32 %v779_v28 }
 0x44a   :  { %v2209_v29 = vpop.eup %2208 }
 0x44b   :  { %v788_v30 = vsel %vm2685_vm4, %v2207_v54, %v2209_v29  ;;  %v2211_v48 = vpop.eup %2210 }
 0x44c   :  { %795 = vrot.lane.b32.xlu0 %v788_v30, %s2456_s17  ;;  %v790_v38 = vmul.f32 %v788_v30, %v2699_v50 }
 0x44e   :  { %v2213_v31 = vpop.eup %2212 }
 0x44f   :  { %v787_v32 = vsel %vm2685_vm4, %v2211_v48, %v2213_v31 }
 0x450   :  { %793 = vrot.lane.b32.xlu1 %v787_v32, %s2456_s17  ;;  %v789_v43 = vmul.f32 %v787_v32, %v2702_v55 }
 0x4be   :  { %v796_v33 = vpop.permute.xlu0 %795 }
 0x4bf   :  { %v800_v34 = vmul.f32 %v796_v33, %v788_v30 }
 0x4c1   :  { %805 = vrot.lane.b32.xlu0 %v800_v34, %s2463_s6 }
 0x4c2   :  { %v794_v35 = vpop.permute.xlu1 %793 }
 0x4c3   :  { %v799_v36 = vmul.f32 %v794_v35, %v787_v32 }
 0x4c5   :  { %803 = vrot.lane.b32.xlu1 %v799_v36, %s2463_s6 }
 0x533   :  { %v806_v40 = vpop.permute.xlu0 %805 }
 0x534   :  { %v2742_v41 = vadd.f32 %v806_v40, %v790_v38 }
 0x536   :  { %2214 = vtanh.f32 %v2742_v41 }
 0x537   :  { %v804_v45 = vpop.permute.xlu1 %803 }
 0x538   :  { %v2746_v47 = vadd.f32 %v804_v45, %v789_v43 }
 0x53a   :  { %2216 = vtanh.f32 %v2746_v47 }
 0x540   :  { %v2215_v51 = vpop.eup %2214 }
 0x541   :  { %817 = vrot.lane.b32.xlu0 %v2215_v51, %s2456_s17 }
 0x544   :  { %v2217_v53 = vpop.eup %2216 }
 0x545   :  { %815 = vrot.lane.b32.xlu1 %v2217_v53, %s2456_s17 }
 0x5b3   :  { %v818_v57 = vpop.permute.xlu0 %817 }
 0x5b4   :  { %v2751_v50 = vmul.f32 %v818_v57, %v788_v30 }
 0x5b6   :  { %v884_v59 = vpack.c.bf16 %v2751_v50, %v2751_v50 }
 0x5b7   :  { %v816_v61 = vpop.permute.xlu1 %815 }
 0x5b8   :  { %v2755_v1 = vmul.f32 %v816_v61, %v787_v32  ;;  %886 = vrot.lane.b32.xlu0 %v884_v59, %s2463_s6 }
 0x5ba   :  { %v837_v55 = vpack.c.bf16 %v2755_v1, %v2755_v1 }
 0x5bc   :  { %839 = vrot.lane.b32.xlu1 %v837_v55, %s2463_s6 }
 0x62a   :  { %v887_v3 = vpop.permute.xlu0 %886 }
 0x62b   :  { %2062 = vmatmul.mubr.msk.bf16.vlgmr.msra.gmra.mrb[16].mxu1 %vm109_vm0, %v887_v3 }
 0x62c   :  { %2074 = vmatpush3.bf16.msra.mxu1 %v2612_v22  ;;  %2077 = vmatprep.mubr.msk.bf16.mxu1 %vm2462_vm1, %v2461_v0 }
 0x62d   :  { %2075 = vmatprep.subr.bf16.mxu1 %v2461_v0 }
 0x62e   :  { %v840_v5 = vpop.permute.xlu1 %839 }
 0x62f   :  { %2054 = vmatmul.mubr.msk.bf16.vlgmr.msra.gmra.mrb[16].mxu0 %vm109_vm0, %v840_v5 }
 0x630   :  { %2066 = vmatpush3.bf16.msra.mxu0 %v2616_v24  ;;  %2076 = vmatpush3.bf16.msra.mxu1 %v2622_v25 }
 0x631   :  { %2067 = vmatprep.subr.bf16.mxu0 %v2461_v0  ;;  %2069 = vmatprep.mubr.msk.bf16.mxu0 %vm2462_vm1, %v2461_v0 }
 0x632   :  { %2089 = vmatprep.subr.bf16.mxu1 %v2461_v0 }
 0x634   :  { %2068 = vmatpush3.bf16.msra.mxu0 %v2626_v26 }
 0x635   :  { %2081 = vmatprep.subr.bf16.mxu0 %v2461_v0 }
 0x6fe   :  { %v925_v6 = vpop.f32.mrb[16].mxu1 }
 0x6ff   :  { %v932_v7 = vadd.f32 %v925_v6, %v2683_v2  ;;  %v2063_v8 = vpop.f32.mrb[17].mxu1 }
 0x700   :  { %v928_v9 = vpop.f32.mrb[18].mxu1 }
 0x701   :  { %v1876_v10 = vmul.f32 -1.442695, %v932_v7  ;;  %v2064_v11 = vpop.f32.mrb[19].mxu1 }
 0x702   :  { %v878_v12 = vpop.f32.mrb[16].mxu0 }
 0x703   :  { %2218 = vpow2.f32 %v1876_v10  ;;  %v931_v13 = vadd.f32 %v878_v12, %v2657_v37  ;;  %v2055_v14 = vpop.f32.mrb[17].mxu0 }
 0x704   :  { %v881_v15 = vpop.f32.mrb[18].mxu0 }
 0x705   :  { %v1875_v16 = vmul.f32 -1.442695, %v931_v13  ;;  %v2056_v17 = vpop.f32.mrb[19].mxu0 }
 0x707   :  { %2220 = vpow2.f32 %v1875_v16 }
 0x708   :  { %2222 = vtanh.f32 %v932_v7 }
 0x70d   :  { %v2219_v18 = vpop.eup %2218 }
 0x70e   :  { %v940_v19 = vadd.f32 1.0, %v2219_v18 }
 0x710   :  { %2224 = vrcp.f32 %v940_v19 }
 0x711   :  { %v2221_v20 = vpop.eup %2220  ;;  %2226 = vtanh.f32 %v931_v13 }
 0x712   :  { %v939_v21 = vadd.f32 1.0, %v2221_v20  ;;  %v2223_v2 = vpop.eup %2222 }
 0x714   :  { %2228 = vrcp.f32 %v939_v21 }
 0x71a   :  { %v2225_v23 = vpop.eup %2224 }
 0x71b   :  { %v948_v28 = vsel %vm2685_vm4, %v2223_v2, %v2225_v23  ;;  %v2227_v37 = vpop.eup %2226 }
 0x71c   :  { %955 = vrot.lane.b32.xlu0 %v948_v28, %s2456_s17  ;;  %v950_v33 = vmul.f32 %v948_v28, %v2742_v41 }
 0x71e   :  { %v2229_v54 = vpop.eup %2228 }
 0x71f   :  { %v947_v29 = vsel %vm2685_vm4, %v2227_v37, %v2229_v54 }
 0x720   :  { %953 = vrot.lane.b32.xlu1 %v947_v29, %s2456_s17  ;;  %v949_v36 = vmul.f32 %v947_v29, %v2746_v47 }
 0x78e   :  { %v956_v30 = vpop.permute.xlu0 %955 }
 0x78f   :  { %v960_v48 = vmul.f32 %v956_v30, %v948_v28 }
 0x791   :  { %965 = vrot.lane.b32.xlu0 %v960_v48, %s2463_s6 }
 0x792   :  { %v954_v31 = vpop.permute.xlu1 %953 }
 0x793   :  { %v959_v32 = vmul.f32 %v954_v31, %v947_v29 }
 0x795   :  { %963 = vrot.lane.b32.xlu1 %v959_v32, %s2463_s6 }
 0x803   :  { %v966_v34 = vpop.permute.xlu0 %965 }
 0x804   :  { %v2786_v35 = vadd.f32 %v966_v34, %v950_v33 }
 0x806   :  { %2230 = vtanh.f32 %v2786_v35 }
 0x807   :  { %v964_v38 = vpop.permute.xlu1 %963 }
 0x808   :  { %v2790_v40 = vadd.f32 %v964_v38, %v949_v36 }
 0x80a   :  { %2232 = vtanh.f32 %v2790_v40 }
 0x810   :  { %v2231_v43 = vpop.eup %2230 }
 0x811   :  { %977 = vrot.lane.b32.xlu0 %v2231_v43, %s2456_s17 }
 0x814   :  { %v2233_v45 = vpop.eup %2232 }
 0x815   :  { %975 = vrot.lane.b32.xlu1 %v2233_v45, %s2456_s17 }
 0x883   :  { %v978_v51 = vpop.permute.xlu0 %977 }
 0x884   :  { %v2795_v41 = vmul.f32 %v978_v51, %v948_v28 }
 0x886   :  { %v1044_v53 = vpack.c.bf16 %v2795_v41, %v2795_v41 }
 0x887   :  { %v976_v57 = vpop.permute.xlu1 %975 }
 0x888   :  { %v2799_v59 = vmul.f32 %v976_v57, %v947_v29  ;;  %1046 = vrot.lane.b32.xlu0 %v1044_v53, %s2463_s6 }
 0x88a   :  { %v997_v47 = vpack.c.bf16 %v2799_v59, %v2799_v59 }
 0x88c   :  { %999 = vrot.lane.b32.xlu1 %v997_v47, %s2463_s6 }
 0x8fa   :  { %v1047_v61 = vpop.permute.xlu0 %1046 }
 0x8fb   :  { %2078 = vmatmul.mubr.msk.bf16.vlgmr.msra.gmra.mrb[20].mxu1 %vm109_vm0, %v1047_v61 }
 0x8fc   :  { %2090 = vmatpush3.bf16.msra.mxu1 %v2612_v22  ;;  %2093 = vmatprep.mubr.msk.bf16.mxu1 %vm2462_vm1, %v2461_v0 }
 0x8fd   :  { %2091 = vmatprep.subr.bf16.mxu1 %v2461_v0 }
 0x8fe   :  { %v1000_v55 = vpop.permute.xlu1 %999 }
 0x8ff   :  { %2070 = vmatmul.mubr.msk.bf16.vlgmr.msra.gmra.mrb[20].mxu0 %vm109_vm0, %v1000_v55 }
 0x900   :  { %2082 = vmatpush3.bf16.msra.mxu0 %v2616_v24  ;;  %2092 = vmatpush3.bf16.msra.mxu1 %v2622_v25 }
 0x901   :  { %2083 = vmatprep.subr.bf16.mxu0 %v2461_v0  ;;  %2085 = vmatprep.mubr.msk.bf16.mxu0 %vm2462_vm1, %v2461_v0 }
 0x902   :  { %2105 = vmatprep.subr.bf16.mxu1 %v2461_v0 }
 0x904   :  { %2084 = vmatpush3.bf16.msra.mxu0 %v2626_v26 }
 0x905   :  { %2097 = vmatprep.subr.bf16.mxu0 %v2461_v0 }
 0x9ce   :  { %v1085_v3 = vpop.f32.mrb[20].mxu1 }
 0x9cf   :  { %v1092_v5 = vadd.f32 %v1085_v3, %v2677_v58  ;;  %v2079_v6 = vpop.f32.mrb[21].mxu1 }
 0x9d0   :  { %v1088_v7 = vpop.f32.mrb[22].mxu1 }
 0x9d1   :  { %v1880_v8 = vmul.f32 -1.442695, %v1092_v5  ;;  %v2080_v9 = vpop.f32.mrb[23].mxu1 }
 0x9d2   :  { %v1038_v10 = vpop.f32.mrb[20].mxu0 }
 0x9d3   :  { %2234 = vpow2.f32 %v1880_v8  ;;  %v1091_v11 = vadd.f32 %v1038_v10, %v2663_v44  ;;  %v2071_v12 = vpop.f32.mrb[21].mxu0 }
 0x9d4   :  { %v1041_v13 = vpop.f32.mrb[22].mxu0 }
 0x9d5   :  { %v1879_v14 = vmul.f32 -1.442695, %v1091_v11  ;;  %v2072_v15 = vpop.f32.mrb[23].mxu0 }
 0x9d7   :  { %2236 = vpow2.f32 %v1879_v14 }
 0x9d8   :  { %2238 = vtanh.f32 %v1092_v5 }
 0x9dd   :  { %v2235_v16 = vpop.eup %2234 }
 0x9de   :  { %v1100_v17 = vadd.f32 1.0, %v2235_v16 }
 0x9e0   :  { %2240 = vrcp.f32 %v1100_v17 }
 0x9e1   :  { %v2237_v18 = vpop.eup %2236  ;;  %2242 = vtanh.f32 %v1091_v11 }
 0x9e2   :  { %v1099_v19 = vadd.f32 1.0, %v2237_v18  ;;  %v2239_v58 = vpop.eup %2238 }
 0x9e4   :  { %2244 = vrcp.f32 %v1099_v19 }
 0x9ea   :  { %v2241_v20 = vpop.eup %2240 }
 0x9eb   :  { %v1108_v21 = vsel %vm2685_vm4, %v2239_v58, %v2241_v20  ;;  %v2243_v44 = vpop.eup %2242 }
 0x9ec   :  { %1115 = vrot.lane.b32.xlu0 %v1108_v21, %s2456_s17  ;;  %v1110_v30 = vmul.f32 %v1108_v21, %v2786_v35 }
 0x9ee   :  { %v2245_v2 = vpop.eup %2244 }
 0x9ef   :  { %v1107_v23 = vsel %vm2685_vm4, %v2243_v44, %v2245_v2 }
 0x9f0   :  { %1113 = vrot.lane.b32.xlu1 %v1107_v23, %s2456_s17  ;;  %v1109_v32 = vmul.f32 %v1107_v23, %v2790_v40 }
 0xa5e   :  { %v1116_v28 = vpop.permute.xlu0 %1115 }
 0xa5f   :  { %v1120_v37 = vmul.f32 %v1116_v28, %v1108_v21 }
 0xa61   :  { %1125 = vrot.lane.b32.xlu0 %v1120_v37, %s2463_s6 }
 0xa62   :  { %v1114_v54 = vpop.permute.xlu1 %1113 }
 0xa63   :  { %v1119_v29 = vmul.f32 %v1114_v54, %v1107_v23 }
 0xa65   :  { %1123 = vrot.lane.b32.xlu1 %v1119_v29, %s2463_s6 }
 0xad3   :  { %v1126_v48 = vpop.permute.xlu0 %1125 }
 0xad4   :  { %v2830_v31 = vadd.f32 %v1126_v48, %v1110_v30 }
 0xad6   :  { %2246 = vtanh.f32 %v2830_v31 }
 0xad7   :  { %v1124_v33 = vpop.permute.xlu1 %1123 }
 0xad8   :  { %v2834_v34 = vadd.f32 %v1124_v33, %v1109_v32 }
 0xada   :  { %2248 = vtanh.f32 %v2834_v34 }
 0xae0   :  { %v2247_v36 = vpop.eup %2246 }
 0xae1   :  { %1137 = vrot.lane.b32.xlu0 %v2247_v36, %s2456_s17 }
 0xae4   :  { %v2249_v38 = vpop.eup %2248 }
 0xae5   :  { %1135 = vrot.lane.b32.xlu1 %v2249_v38, %s2456_s17 }
 0xb53   :  { %v1138_v43 = vpop.permute.xlu0 %1137 }
 0xb54   :  { %v2839_v35 = vmul.f32 %v1138_v43, %v1108_v21 }
 0xb56   :  { %v1204_v45 = vpack.c.bf16 %v2839_v35, %v2839_v35 }
 0xb57   :  { %v1136_v51 = vpop.permute.xlu1 %1135 }
 0xb58   :  { %v2843_v53 = vmul.f32 %v1136_v51, %v1107_v23  ;;  %1206 = vrot.lane.b32.xlu0 %v1204_v45, %s2463_s6 }
 0xb5a   :  { %v1157_v40 = vpack.c.bf16 %v2843_v53, %v2843_v53 }
 0xb5c   :  { %1159 = vrot.lane.b32.xlu1 %v1157_v40, %s2463_s6 }
 0xbca   :  { %v1207_v57 = vpop.permute.xlu0 %1206 }
 0xbcb   :  { %2094 = vmatmul.mubr.msk.bf16.vlgmr.msra.gmra.mrb[24].mxu1 %vm109_vm0, %v1207_v57 }
 0xbcc   :  { %2106 = vmatpush3.bf16.msra.mxu1 %v2612_v22  ;;  %2109 = vmatprep.mubr.msk.bf16.mxu1 %vm2462_vm1, %v2461_v0 }
 0xbcd   :  { %2107 = vmatprep.subr.bf16.mxu1 %v2461_v0 }
 0xbce   :  { %v1160_v47 = vpop.permute.xlu1 %1159 }
 0xbcf   :  { %2086 = vmatmul.mubr.msk.bf16.vlgmr.msra.gmra.mrb[24].mxu0 %vm109_vm0, %v1160_v47 }
 0xbd0   :  { %2098 = vmatpush3.bf16.msra.mxu0 %v2616_v24  ;;  %2108 = vmatpush3.bf16.msra.mxu1 %v2622_v25 }
 0xbd1   :  { %2099 = vmatprep.subr.bf16.mxu0 %v2461_v0  ;;  %2101 = vmatprep.mubr.msk.bf16.mxu0 %vm2462_vm1, %v2461_v0 }
 0xbd2   :  { %2121 = vmatprep.subr.bf16.mxu1 %v2461_v0 }
 0xbd4   :  { %2100 = vmatpush3.bf16.msra.mxu0 %v2626_v26 }
 0xbd5   :  { %2113 = vmatprep.subr.bf16.mxu0 %v2461_v0 }
 0xc9e   :  { %v1245_v61 = vpop.f32.mrb[24].mxu1 }
 0xc9f   :  { %v1252_v55 = vadd.f32 %v1245_v61, %v2665_v46  ;;  %v2095_v3 = vpop.f32.mrb[25].mxu1 }
 0xca0   :  { %v1248_v5 = vpop.f32.mrb[26].mxu1 }
 0xca1   :  { %v1884_v6 = vmul.f32 -1.442695, %v1252_v55  ;;  %v2096_v7 = vpop.f32.mrb[27].mxu1 }
 0xca2   :  { %v1198_v8 = vpop.f32.mrb[24].mxu0 }
 0xca3   :  { %2250 = vpow2.f32 %v1884_v6  ;;  %v1251_v9 = vadd.f32 %v1198_v8, %v2675_v56  ;;  %v2087_v10 = vpop.f32.mrb[25].mxu0 }
 0xca4   :  { %v1201_v11 = vpop.f32.mrb[26].mxu0 }
 0xca5   :  { %v1883_v12 = vmul.f32 -1.442695, %v1251_v9  ;;  %v2088_v13 = vpop.f32.mrb[27].mxu0 }
 0xca7   :  { %2252 = vpow2.f32 %v1883_v12 }
 0xca8   :  { %2254 = vtanh.f32 %v1252_v55 }
 0xcad   :  { %v2251_v14 = vpop.eup %2250 }
 0xcae   :  { %v1260_v15 = vadd.f32 1.0, %v2251_v14 }
 0xcb0   :  { %2256 = vrcp.f32 %v1260_v15 }
 0xcb1   :  { %v2253_v16 = vpop.eup %2252  ;;  %2258 = vtanh.f32 %v1251_v9 }
 0xcb2   :  { %v1259_v17 = vadd.f32 1.0, %v2253_v16  ;;  %v2255_v46 = vpop.eup %2254 }
 0xcb4   :  { %2260 = vrcp.f32 %v1259_v17 }
 0xcba   :  { %v2257_v18 = vpop.eup %2256 }
 0xcbb   :  { %v1268_v19 = vsel %vm2685_vm4, %v2255_v46, %v2257_v18  ;;  %v2259_v56 = vpop.eup %2258 }
 0xcbc   :  { %1275 = vrot.lane.b32.xlu0 %v1268_v19, %s2456_s17  ;;  %v1270_v28 = vmul.f32 %v1268_v19, %v2830_v31 }
 0xcbe   :  { %v2261_v58 = vpop.eup %2260 }
 0xcbf   :  { %v1267_v20 = vsel %vm2685_vm4, %v2259_v56, %v2261_v58 }
 0xcc0   :  { %1273 = vrot.lane.b32.xlu1 %v1267_v20, %s2456_s17  ;;  %v1269_v29 = vmul.f32 %v1267_v20, %v2834_v34 }
 0xd2e   :  { %v1276_v21 = vpop.permute.xlu0 %1275 }
 0xd2f   :  { %v1280_v44 = vmul.f32 %v1276_v21, %v1268_v19 }
 0xd31   :  { %1285 = vrot.lane.b32.xlu0 %v1280_v44, %s2463_s6 }
 0xd32   :  { %v1274_v2 = vpop.permute.xlu1 %1273 }
 0xd33   :  { %v1279_v23 = vmul.f32 %v1274_v2, %v1267_v20 }
 0xd35   :  { %1283 = vrot.lane.b32.xlu1 %v1279_v23, %s2463_s6 }
 0xda3   :  { %v1286_v37 = vpop.permute.xlu0 %1285 }
 0xda4   :  { %v2874_v54 = vadd.f32 %v1286_v37, %v1270_v28 }
 0xda6   :  { %2262 = vtanh.f32 %v2874_v54 }
 0xda7   :  { %v1284_v30 = vpop.permute.xlu1 %1283 }
 0xda8   :  { %v2878_v48 = vadd.f32 %v1284_v30, %v1269_v29 }
 0xdaa   :  { %2264 = vtanh.f32 %v2878_v48 }
 0xdb0   :  { %v2263_v32 = vpop.eup %2262 }
 0xdb1   :  { %1297 = vrot.lane.b32.xlu0 %v2263_v32, %s2456_s17 }
 0xdb4   :  { %v2265_v33 = vpop.eup %2264 }
 0xdb5   :  { %1295 = vrot.lane.b32.xlu1 %v2265_v33, %s2456_s17 }
 0xe23   :  { %v1298_v36 = vpop.permute.xlu0 %1297 }
 0xe24   :  { %v2883_v31 = vmul.f32 %v1298_v36, %v1268_v19 }
 0xe26   :  { %v1364_v38 = vpack.c.bf16 %v2883_v31, %v2883_v31 }
 0xe27   :  { %v1296_v43 = vpop.permute.xlu1 %1295 }
 0xe28   :  { %v2887_v45 = vmul.f32 %v1296_v43, %v1267_v20  ;;  %1366 = vrot.lane.b32.xlu0 %v1364_v38, %s2463_s6 }
 0xe2a   :  { %v1317_v34 = vpack.c.bf16 %v2887_v45, %v2887_v45 }
 0xe2c   :  { %1319 = vrot.lane.b32.xlu1 %v1317_v34, %s2463_s6 }
 0xe9a   :  { %v1367_v51 = vpop.permute.xlu0 %1366 }
 0xe9b   :  { %2110 = vmatmul.mubr.msk.bf16.vlgmr.msra.gmra.mrb[28].mxu1 %vm109_vm0, %v1367_v51 }
 0xe9c   :  { %2122 = vmatpush3.bf16.msra.mxu1 %v2612_v22  ;;  %2125 = vmatprep.mubr.msk.bf16.mxu1 %vm2462_vm1, %v2461_v0 }
 0xe9d   :  { %2123 = vmatprep.subr.bf16.mxu1 %v2461_v0 }
 0xe9e   :  { %v1320_v40 = vpop.permute.xlu1 %1319 }
 0xe9f   :  { %2102 = vmatmul.mubr.msk.bf16.vlgmr.msra.gmra.mrb[28].mxu0 %vm109_vm0, %v1320_v40 }
 0xea0   :  { %2114 = vmatpush3.bf16.msra.mxu0 %v2616_v24  ;;  %2124 = vmatpush3.bf16.msra.mxu1 %v2622_v25 }
 0xea1   :  { %2115 = vmatprep.subr.bf16.mxu0 %v2461_v0  ;;  %2117 = vmatprep.mubr.msk.bf16.mxu0 %vm2462_vm1, %v2461_v0 }
 0xea2   :  { %2137 = vmatprep.subr.bf16.mxu1 %v2461_v0 }
 0xea4   :  { %2116 = vmatpush3.bf16.msra.mxu0 %v2626_v26 }
 0xea5   :  { %2129 = vmatprep.subr.bf16.mxu0 %v2461_v0 }
 0xf6e   :  { %v1405_v57 = vpop.f32.mrb[28].mxu1 }
 0xf6f   :  { %v1412_v47 = vadd.f32 %v1405_v57, %v2659_v39  ;;  %v2111_v61 = vpop.f32.mrb[29].mxu1 }
 0xf70   :  { %v1408_v55 = vpop.f32.mrb[30].mxu1 }
 0xf71   :  { %v1888_v3 = vmul.f32 -1.442695, %v1412_v47  ;;  %v2112_v5 = vpop.f32.mrb[31].mxu1 }
 0xf72   :  { %v1358_v6 = vpop.f32.mrb[28].mxu0 }
 0xf73   :  { %2266 = vpow2.f32 %v1888_v3  ;;  %v1411_v7 = vadd.f32 %v1358_v6, %v2681_v63  ;;  %v2103_v8 = vpop.f32.mrb[29].mxu0 }
 0xf74   :  { %v1361_v9 = vpop.f32.mrb[30].mxu0 }
 0xf75   :  { %v1887_v10 = vmul.f32 -1.442695, %v1411_v7  ;;  %v2104_v11 = vpop.f32.mrb[31].mxu0 }
 0xf77   :  { %2268 = vpow2.f32 %v1887_v10 }
 0xf78   :  { %2270 = vtanh.f32 %v1412_v47 }
 0xf7d   :  { %v2267_v12 = vpop.eup %2266 }
 0xf7e   :  { %v1420_v13 = vadd.f32 1.0, %v2267_v12 }
 0xf80   :  { %2272 = vrcp.f32 %v1420_v13 }
 0xf81   :  { %v2269_v14 = vpop.eup %2268  ;;  %2274 = vtanh.f32 %v1411_v7 }
 0xf82   :  { %v1419_v15 = vadd.f32 1.0, %v2269_v14  ;;  %v2271_v39 = vpop.eup %2270 }
 0xf84   :  { %2276 = vrcp.f32 %v1419_v15 }
 0xf8a   :  { %v2273_v16 = vpop.eup %2272 }
 0xf8b   :  { %v1428_v17 = vsel %vm2685_vm4, %v2271_v39, %v2273_v16  ;;  %v2275_v63 = vpop.eup %2274 }
 0xf8c   :  { %1435 = vrot.lane.b32.xlu0 %v1428_v17, %s2456_s17  ;;  %v1430_v21 = vmul.f32 %v1428_v17, %v2874_v54 }
 0xf8e   :  { %v2277_v46 = vpop.eup %2276 }
 0xf8f   :  { %v1427_v18 = vsel %vm2685_vm4, %v2275_v63, %v2277_v46 }
 0xf90   :  { %1433 = vrot.lane.b32.xlu1 %v1427_v18, %s2456_s17  ;;  %v1429_v23 = vmul.f32 %v1427_v18, %v2878_v48 }
 0xffe   :  { %v1436_v19 = vpop.permute.xlu0 %1435 }
 0xfff   :  { %v1440_v56 = vmul.f32 %v1436_v19, %v1428_v17 }
0x1001   :  { %1445 = vrot.lane.b32.xlu0 %v1440_v56, %s2463_s6 }
0x1002   :  { %v1434_v58 = vpop.permute.xlu1 %1433 }
0x1003   :  { %v1439_v20 = vmul.f32 %v1434_v58, %v1427_v18 }
0x1005   :  { %1443 = vrot.lane.b32.xlu1 %v1439_v20, %s2463_s6 }
0x1073   :  { %v1446_v44 = vpop.permute.xlu0 %1445 }
0x1074   :  { %v2918_v2 = vadd.f32 %v1446_v44, %v1430_v21 }
0x1076   :  { %2278 = vtanh.f32 %v2918_v2 }
0x1077   :  { %v1444_v28 = vpop.permute.xlu1 %1443 }
0x1078   :  { %v2922_v37 = vadd.f32 %v1444_v28, %v1429_v23 }
0x107a   :  { %2280 = vtanh.f32 %v2922_v37 }
0x1080   :  { %v2279_v29 = vpop.eup %2278 }
0x1081   :  { %1457 = vrot.lane.b32.xlu0 %v2279_v29, %s2456_s17 }
0x1084   :  { %v2281_v30 = vpop.eup %2280 }
0x1085   :  { %1455 = vrot.lane.b32.xlu1 %v2281_v30, %s2456_s17 }
0x10f3   :  { %v1458_v32 = vpop.permute.xlu0 %1457 }
0x10f4   :  { %v2927_v54 = vmul.f32 %v1458_v32, %v1428_v17 }
0x10f6   :  { %v1524_v33 = vpack.c.bf16 %v2927_v54, %v2927_v54 }
0x10f7   :  { %v1456_v36 = vpop.permute.xlu1 %1455 }
0x10f8   :  { %v2931_v38 = vmul.f32 %v1456_v36, %v1427_v18  ;;  %1526 = vrot.lane.b32.xlu0 %v1524_v33, %s2463_s6 }
0x10fa   :  { %v1477_v48 = vpack.c.bf16 %v2931_v38, %v2931_v38 }
0x10fc   :  { %1479 = vrot.lane.b32.xlu1 %v1477_v48, %s2463_s6 }
0x116a   :  { %v1527_v43 = vpop.permute.xlu0 %1526 }
0x116b   :  { %2126 = vmatmul.mubr.msk.bf16.vlgmr.msra.gmra.mrb[32].mxu1 %vm109_vm0, %v1527_v43 }
0x116c   :  { %2138 = vmatpush3.bf16.msra.mxu1 %v2612_v22  ;;  %2141 = vmatprep.mubr.msk.bf16.mxu1 %vm2462_vm1, %v2461_v0 }
0x116d   :  { %2139 = vmatprep.subr.bf16.mxu1 %v2461_v0 }
0x116e   :  { %v1480_v34 = vpop.permute.xlu1 %1479 }
0x116f   :  { %2118 = vmatmul.mubr.msk.bf16.vlgmr.msra.gmra.mrb[32].mxu0 %vm109_vm0, %v1480_v34 }
0x1170   :  { %2130 = vmatpush3.bf16.msra.mxu0 %v2616_v24  ;;  %2140 = vmatpush3.bf16.msra.mxu1 %v2622_v25 }
0x1171   :  { %2131 = vmatprep.subr.bf16.mxu0 %v2461_v0  ;;  %2133 = vmatprep.mubr.msk.bf16.mxu0 %vm2462_vm1, %v2461_v0 }
0x1174   :  { %2132 = vmatpush3.bf16.msra.mxu0 %v2626_v26 }
0x123e   :  { %v1565_v22 = vpop.f32.mrb[32].mxu1 }
0x123f   :  { %v1572_v51 = vadd.f32 %v1565_v22, %v2669_v49  ;;  %v2127_v40 = vpop.f32.mrb[33].mxu1 }
0x1240   :  { %v1568_v57 = vpop.f32.mrb[34].mxu1 }
0x1241   :  { %v1892_v47 = vmul.f32 -1.442695, %v1572_v51  ;;  %v2128_v61 = vpop.f32.mrb[35].mxu1 }
0x1242   :  { %v1518_v55 = vpop.f32.mrb[32].mxu0 }
0x1243   :  { %2282 = vpow2.f32 %v1892_v47  ;;  %v1571_v24 = vadd.f32 %v1518_v55, %v2671_v52  ;;  %v2119_v3 = vpop.f32.mrb[33].mxu0 }
0x1244   :  { %v1521_v25 = vpop.f32.mrb[34].mxu0 }
0x1245   :  { %v1891_v5 = vmul.f32 -1.442695, %v1571_v24  ;;  %v2120_v6 = vpop.f32.mrb[35].mxu0 }
0x1247   :  { %2284 = vpow2.f32 %v1891_v5 }
0x1248   :  { %2286 = vtanh.f32 %v1572_v51 }
0x124d   :  { %v2283_v7 = vpop.eup %2282 }
0x124e   :  { %v1580_v0 = vadd.f32 1.0, %v2283_v7 }
0x1250   :  { %2288 = vrcp.f32 %v1580_v0  ;;  %v2464_v0 = vmov -inf  }
0x1251   :  { %v2285_v26 = vpop.eup %2284  ;;  %2290 = vtanh.f32 %v1571_v24  ;;  %115 = vst.msk [vmem:[#allocation4 + $0x8] sm:$0xff] %vm109_vm0, %v2464_v0  ;;  %114 = vst.msk [vmem:[#allocation4] sm:$0xff] %vm109_vm0, %v2464_v0 }
0x1252   :  { %v1579_v8 = vadd.f32 1.0, %v2285_v26  ;;  %v2287_v49 = vpop.eup %2286 }
0x1254   :  { %2292 = vrcp.f32 %v1579_v8 }
0x125a   :  { %v2289_v9 = vpop.eup %2288 }
0x125b   :  { %v1588_v10 = vsel %vm2685_vm4, %v2287_v49, %v2289_v9  ;;  %v2291_v52 = vpop.eup %2290 }
0x125c   :  { %1595 = vrot.lane.b32.xlu0 %v1588_v10, %s2456_s17  ;;  %v1590_v16 = vmul.f32 %v1588_v10, %v2918_v2 }
0x125e   :  { %v2293_v11 = vpop.eup %2292 }
0x125f   :  { %v1587_v12 = vsel %vm2685_vm4, %v2291_v52, %v2293_v11 }
0x1260   :  { %1593 = vrot.lane.b32.xlu1 %v1587_v12, %s2456_s17  ;;  %v1589_v46 = vmul.f32 %v1587_v12, %v2922_v37 }
0x12ce   :  { %v1596_v13 = vpop.permute.xlu0 %1595 }
0x12cf   :  { %v1600_v14 = vmul.f32 %v1596_v13, %v1588_v10 }
0x12d1   :  { %1605 = vrot.lane.b32.xlu0 %v1600_v14, %s2463_s6 }
0x12d2   :  { %v1594_v15 = vpop.permute.xlu1 %1593 }
0x12d3   :  { %v1599_v39 = vmul.f32 %v1594_v15, %v1587_v12 }
0x12d5   :  { %1603 = vrot.lane.b32.xlu1 %v1599_v39, %s2463_s6 }
0x1343   :  { %v1606_v17 = vpop.permute.xlu0 %1605 }
0x1344   :  { %v2960_v63 = vadd.f32 %v1606_v17, %v1590_v16 }
0x1346   :  { %2294 = vtanh.f32 %v2960_v63 }
0x1347   :  { %v1604_v18 = vpop.permute.xlu1 %1603 }
0x1348   :  { %v2964_v19 = vadd.f32 %v1604_v18, %v1589_v46 }
0x134a   :  { %2296 = vtanh.f32 %v2964_v19 }
0x1350   :  { %v2295_v56 = vpop.eup %2294 }
0x1351   :  { %1617 = vrot.lane.b32.xlu0 %v2295_v56, %s2456_s17 }
0x1354   :  { %v2297_v58 = vpop.eup %2296 }
0x1355   :  { %1615 = vrot.lane.b32.xlu1 %v2297_v58, %s2456_s17 }
0x13c3   :  { %v1618_v20 = vpop.permute.xlu0 %1617 }
0x13c4   :  { %v1622_v21 = vmul.f32 %v1618_v20, %v1588_v10 }
0x13c6   :  { %v1683_v44 = vpack.c.bf16 %v1622_v21, %v1622_v21 }
0x13c7   :  { %v1616_v2 = vpop.permute.xlu1 %1615 }
0x13c8   :  { %v2969_v23 = vmul.f32 %v1616_v2, %v1587_v12  ;;  %1685 = vrot.lane.b32.xlu0 %v1683_v44, %s2463_s6 }
0x13ca   :  { %v1636_v28 = vpack.c.bf16 %v2969_v23, %v2969_v23 }
0x13cc   :  { %1638 = vrot.lane.b32.xlu1 %v1636_v28, %s2463_s6 }
0x143a   :  { %v1686_v37 = vpop.permute.xlu0 %1685 }
0x143b   :  { %2142 = vmatmul.mubr.msk.bf16.vlgmr.msra.gmra.mrb[36].mxu1 %vm109_vm0, %v1686_v37 }
0x143e   :  { %v1639_v29 = vpop.permute.xlu1 %1638 }
0x143f   :  { %2134 = vmatmul.mubr.msk.bf16.vlgmr.msra.gmra.mrb[36].mxu0 %vm109_vm0, %v1639_v29 }
0x150e   :  { %v1724_v30 = vpop.f32.mrb[36].mxu1 }
0x150f   :  { %v1731_v32 = vadd.f32 %v1724_v30, %v2661_v42  ;;  %v2143_v33 = vpop.f32.mrb[37].mxu1 }
0x1510   :  { %v1727_v36 = vpop.f32.mrb[38].mxu1 }
0x1511   :  { %v1896_v48 = vmul.f32 -1.442695, %v1731_v32  ;;  %v2144_v43 = vpop.f32.mrb[39].mxu1 }
0x1512   :  { %v1677_v34 = vpop.f32.mrb[36].mxu0 }
0x1513   :  { %2298 = vpow2.f32 %v1896_v48  ;;  %v1730_v22 = vadd.f32 %v1677_v34, %v2679_v60  ;;  %v2135_v51 = vpop.f32.mrb[37].mxu0 }
0x1514   :  { %v1680_v40 = vpop.f32.mrb[38].mxu0 }
0x1515   :  { %v1895_v57 = vmul.f32 -1.442695, %v1730_v22  ;;  %v2136_v47 = vpop.f32.mrb[39].mxu0 }
0x1517   :  { %2300 = vpow2.f32 %v1895_v57 }
0x1518   :  { %2302 = vtanh.f32 %v1731_v32 }
0x151d   :  { %v2299_v61 = vpop.eup %2298 }
0x151e   :  { %v1739_v55 = vadd.f32 1.0, %v2299_v61 }
0x1520   :  { %2304 = vrcp.f32 %v1739_v55 }
0x1521   :  { %v2301_v24 = vpop.eup %2300  ;;  %2306 = vtanh.f32 %v1730_v22 }
0x1522   :  { %v1738_v3 = vadd.f32 1.0, %v2301_v24  ;;  %v2303_v42 = vpop.eup %2302 }
0x1524   :  { %2308 = vrcp.f32 %v1738_v3 }
0x152a   :  { %v2305_v25 = vpop.eup %2304 }
0x152b   :  { %v1747_v5 = vsel %vm2685_vm4, %v2303_v42, %v2305_v25  ;;  %v2307_v60 = vpop.eup %2306 }
0x152c   :  { %1754 = vrot.lane.b32.xlu0 %v1747_v5, %s2456_s17  ;;  %v1749_v27 = vmul.f32 %v1747_v5, %v2960_v63 }
0x152e   :  { %v2309_v6 = vpop.eup %2308 }
0x152f   :  { %v1746_v7 = vsel %vm2685_vm4, %v2307_v60, %v2309_v6 }
0x1530   :  { %1752 = vrot.lane.b32.xlu1 %v1746_v7, %s2456_s17  ;;  %v1748_v13 = vmul.f32 %v1746_v7, %v2964_v19 }
0x159e   :  { %v1755_v26 = vpop.permute.xlu0 %1754 }
0x159f   :  { %v1759_v8 = vmul.f32 %v1755_v26, %v1747_v5 }
0x15a1   :  { %1764 = vrot.lane.b32.xlu0 %v1759_v8, %s2463_s6 }
0x15a2   :  { %v1753_v49 = vpop.permute.xlu1 %1752 }
0x15a3   :  { %v1758_v9 = vmul.f32 %v1753_v49, %v1746_v7 }
0x15a5   :  { %1762 = vrot.lane.b32.xlu1 %v1758_v9, %s2463_s6 }
0x15a9   :  { %667 = vrot.lane.b32.xlu1 %v2707_v62, %s2463_s6 }
0x15ad   :  { %987 = vrot.lane.b32.xlu1 %v2795_v41, %s2463_s6 }
0x15b1   :  { %1307 = vrot.lane.b32.xlu1 %v2883_v31, %s2463_s6 }
0x15b5   :  { %1627 = vrot.lane.b32.xlu1 %v1622_v21, %s2463_s6  ;;  %v485_v21 = vld [vmem:[#allocation4] sm:$0xff] }
0x1613   :  { %v1765_v10 = vpop.permute.xlu0 %1764 }
0x1614   :  { %v1769_v52 = vadd.f32 %v1765_v10, %v1749_v27 }
0x1616   :  { %2310 = vtanh.f32 %v1769_v52 }
0x1617   :  { %v1763_v11 = vpop.permute.xlu1 %1762 }
0x1618   :  { %v1768_v62 = vadd.f32 %v1763_v11, %v1748_v13 }
0x161a   :  { %2312 = vtanh.f32 %v1768_v62 }
0x1620   :  { %v2311_v12 = vpop.eup %2310 }
0x1621   :  { %1776 = vrot.lane.b32.xlu0 %v2311_v12, %s2456_s17 }
0x1624   :  { %v2313_v41 = vpop.eup %2312 }
0x1625   :  { %827 = vrot.lane.b32.xlu0 %v2751_v50, %s2463_s6  ;;  %v668_v50 = vpop.permute.xlu1 %667 }
0x1629   :  { %1147 = vrot.lane.b32.xlu0 %v2839_v35, %s2463_s6  ;;  %v486_v35 = vld [vmem:[#allocation4 + $0x8] sm:$0xff]  ;;  %v988_v15 = vpop.permute.xlu1 %987 }
0x162d   :  { %1467 = vrot.lane.b32.xlu0 %v2927_v54, %s2463_s6  ;;  %v672_v54 = vmax.f32 %v486_v35, %v668_v50 }
0x1631   :  { %1774 = vrot.lane.b32.xlu0 %v2313_v41, %s2456_s17  ;;  %s2466_s17 = smov [#allocation16]  }
0x1632   :  { %s1822_s26 = sshll.u32 %s2466_s17, 4  ;;  %s1823_s26 = int_to_ptr.vmem [resolvable:$true] %s1822_s26 }
0x1633   :  { %s2424_s27 = scalar_lea.vmem %s1823_s26, 128  ;;  %p2429_p13 = scmp.lt.s32.totalorder %s1823_s26, %s1823_s26 }
0x1634   :  { %p2425_p12 = scmp.ne.s32.totalorder %s1823_s26, %s2424_s27  ;;  %p2430_p0 = scmp.lt.s32.totalorder %s2424_s27, %s2424_s27 }
0x1635   :  { %665 = vrot.lane.b32.xlu0 %v2711_v4, %s2463_s6 }
0x1636   :  { %p2431_p1 = por %p2430_p0, %p2429_p13 }
0x1638   :  { %p2432_p2 = pnand %p2431_p1, %p2425_p12 }
0x1639   :  { %985 = vrot.lane.b32.xlu0 %v2799_v59, %s2463_s6 }
0x163d   :  { %1305 = vrot.lane.b32.xlu0 %v2887_v45, %s2463_s6  ;;  %v1308_v45 = vpop.permute.xlu1 %1307 }
0x1641   :  { %1625 = vrot.lane.b32.xlu0 %v2969_v23, %s2463_s6 }
0x1693   :  { %v1777_v31 = vpop.permute.xlu0 %1776 }
0x1694   :  { %v1781_v14 = vmul.f32 %v1777_v31, %v1747_v5 }
0x1696   :  { %1786 = vrot.lane.b32.xlu1 %v1781_v14, %s2463_s6 }
0x1697   :  { %v828_v39 = vpop.permute.xlu0 %827 }
0x1698   :  { %v832_v16 = vmax.f32 %v672_v54, %v828_v39 }
0x169a   :  { %825 = vrot.lane.b32.xlu1 %v2755_v1, %s2463_s6  ;;  %v992_v4 = vmax.f32 %v832_v16, %v988_v15  ;;  %v1628_v1 = vpop.permute.xlu1 %1627 }
0x169b   :  { %v1148_v59 = vpop.permute.xlu0 %1147 }
0x169c   :  { %v1152_v17 = vmax.f32 %v992_v4, %v1148_v59 }
0x169e   :  { %1145 = vrot.lane.b32.xlu1 %v2843_v53, %s2463_s6  ;;  %v1312_v63 = vmax.f32 %v1152_v17, %v1308_v45 }
0x169f   :  { %v1468_v46 = vpop.permute.xlu0 %1467 }
0x16a0   :  { %v1472_v18 = vmax.f32 %v1312_v63, %v1468_v46 }
0x16a2   :  { %1465 = vrot.lane.b32.xlu1 %v2931_v38, %s2463_s6  ;;  %v1632_v20 = vmax.f32 %v1472_v18, %v1628_v1 }
0x16a3   :  { %v1775_v19 = vpop.permute.xlu0 %1774 }
0x16a4   :  { %v1780_v56 = vmul.f32 %v1775_v19, %v1746_v7 }
0x16a6   :  { %1784 = vrot.lane.b32.xlu1 %v1780_v56, %s2463_s6 }
0x16a7   :  { %v666_v58 = vpop.permute.xlu0 %665 }
0x16a8   :  { %v671_v23 = vmax.f32 %v485_v21, %v666_v58 }
0x16aa   :  { %1796 = vrot.lane.b32.xlu1 %v1768_v62, %s2465_s7 }
0x16ab   :  { %v986_v53 = vpop.permute.xlu0 %985 }
0x16af   :  { %v1306_v29 = vpop.permute.xlu0 %1305 }
0x16b3   :  { %v1626_v43 = vpop.permute.xlu0 %1625 }
0x1708   :  { %v1787_v44 = vpop.permute.xlu1 %1786 }
0x1709   :  { %v1791_v2 = vmax.f32 %v1632_v20, %v1787_v44  ;;  %1793 = vst.msk [vmem:[#allocation2 + $0x8] sm:$0xff] %vm109_vm0, %v1787_v44 }
0x170b   :  { %1805 = vst.msk [vmem:[#allocation4 + $0x8] sm:$0xff] %vm109_vm0, %v1791_v2  ;;  %1810 = vrot.lane.b32.xlu0 %v1791_v2, %s2463_s6 }
0x170c   :  { %v826_v38 = vpop.permute.xlu1 %825 }
0x170d   :  { %v831_v28 = vmax.f32 %v671_v23, %v826_v38 }
0x170f   :  { %1798 = vrot.lane.b32.xlu0 %v1769_v52, %s2465_s7  ;;  %v991_v37 = vmax.f32 %v831_v28, %v986_v53 }
0x1710   :  { %v1146_v30 = vpop.permute.xlu1 %1145 }
0x1711   :  { %v1151_v32 = vmax.f32 %v991_v37, %v1146_v30 }
0x1713   :  { %v1311_v33 = vmax.f32 %v1151_v32, %v1306_v29 }
0x1714   :  { %v1466_v36 = vpop.permute.xlu1 %1465 }
0x1715   :  { %v1471_v48 = vmax.f32 %v1311_v33, %v1466_v36 }
0x1717   :  { %v1631_v34 = vmax.f32 %v1471_v48, %v1626_v43 }
0x1718   :  { %v1785_v22 = vpop.permute.xlu1 %1784 }
0x1719   :  { %v1790_v51 = vmax.f32 %v1631_v34, %v1785_v22  ;;  %1792 = vst.msk [vmem:[#allocation2] sm:$0xff] %vm109_vm0, %v1785_v22 }
0x171b   :  { %1804 = vst.msk [vmem:[#allocation4] sm:$0xff] %vm109_vm0, %v1790_v51 }
0x171c   :  { %v1797_v40 = vpop.permute.xlu1 %1796 }
0x171d   :  { %1802 = vst.msk [vmem:[#allocation3] sm:$0xff] %vm109_vm0, %v1797_v40 }
0x177d   :  { %v1811_v57 = vpop.permute.xlu0 %1810 }
0x177e   :  { %v1813_v47 = vsel %vm109_vm0, %v1790_v51, %v1811_v57 }
0x177f   :  { %1815 = vst.msk [vmem:[#allocation16] sm:$0xff] %vm1814_vm5, %v1813_v47 }
0x1780   :  { %2435 = shalt.err (!%p2432_p2)
}
0x1781   :  { %s2436_s28 = scalar_lea.hbm %s3050_s8, 128 }
0x1782   :  { %p2437_p3 = scmp.ne.s32.totalorder %s3050_s8, %s2436_s28  ;;  %p2440_p4 = scmp.lt.u32.totalorder %s2436_s28, %s3050_s8 }
0x1784   :  { %p2442_p5 = pnand %p2440_p4, %p2437_p3 }
0x1786   :  { %2445 = shalt.err (!%p2442_p5)
}
0x1787   :  { %1825 = dma.vmem_to_hbm [thread:$0]  %s1823_s26, 128, %s3050_s8, [#allocation9]   ;;  %v1799_v61 = vpop.permute.xlu0 %1798 }
0x1788   :  { %1803 = vst.msk [vmem:[#allocation3 + $0x8] sm:$0xff] %vm109_vm0, %v1799_v61 }
0x1789   :  { %2452 = dma.done.wait [#allocation9], 128  }
0x178a   :  { %2453 = vsyncadd [#allocation9], 4294967168 }
0x178b   :  { %1829 = vsyncpa [#allocation8], 1 }
0x178c   :  { %1830 = vsyncpa [#allocation11], 1 }
0x178d   :  { %1831 = vsyncpa [#allocation14], 1 }
0x178e   :  { %1832 = vsyncpa [#allocation9], 1 }

</bundles_post_ra>
